<compile_context>
chip_gen: v7x
topology: tpu7x:2x2x1
jax: 0.10.0
libtpu: 0.0.40
codegen_flags: <defaults>
</compile_context>

<pallas_src>
import math

import jax
import jax.numpy as jnp
from jax.experimental import pallas as pl
from jax.experimental.pallas import tpu as pltpu

EPS = 1e-5
LANE = 128


def _round_up(x, m):
    return ((x + m - 1) // m) * m


def _pad_last(a, target):
    return jnp.pad(a, [(0, 0)] * (a.ndim - 1) + [(0, target - a.shape[-1])])


# --------------------------------------------------------------------------
# Fused kernel: conv1 (im2col) + BN1 + ReLU + conv2 (9 taps) + BN2 + ReLU.
# Whole batch resident in VMEM; single grid step.
# --------------------------------------------------------------------------
def down_fused_kernel(slab_ref, w1_ref, b1_ref, g1_ref, be1_ref,
                      w2_ref, b2_ref, g2_ref, be2_ref,
                      o_ref, pad_ref):
    # slab_ref: (N*H*W, K1p)          im2col of the max-pooled input (K = 9*Cin)
    # w1_ref  : (K1p, Cp)             conv1 weights, Cout padded to lane width
    # w2_ref  : (9, Cp, Cp)           conv2 weights, taps flattened
    # o_ref   : (N, Cout, H*W)        lane-dense NCHW-style output
    # pad_ref : (N, H+2, W+2, Cp)     zero-padded conv2 input (VMEM scratch)
    N, Cout, HW = o_ref.shape
    H = pad_ref.shape[1] - 2
    W = pad_ref.shape[2] - 2
    Cp = pad_ref.shape[3]
    count = float(N * H * W)

    # ---- conv1: one im2col matmul over the whole batch ----------------------
    y1 = jnp.dot(slab_ref[...], w1_ref[...],
                 preferred_element_type=jnp.float32) + b1_ref[...]     # (N*HW, Cp)

    # ---- BN1 (two-pass, biased training stats) + ReLU ------------------------
    mean1 = jnp.sum(y1, axis=0, keepdims=True) / count
    var1 = jnp.sum((y1 - mean1) ** 2, axis=0, keepdims=True) / count
    sc1 = g1_ref[...] * jax.lax.rsqrt(var1 + EPS)
    sh1 = be1_ref[...] - mean1 * sc1
    h1 = jnp.maximum(y1 * sc1 + sh1, 0.0)                              # (N*HW, Cp)

    # ---- stage h1 into the zero-padded conv2 input buffer --------------------
    pad_ref[...] = jnp.zeros_like(pad_ref)
    for n in range(N):
        pad_ref[n, 1:H + 1, 1:W + 1, :] = (
            h1[n * HW:(n + 1) * HW, :].reshape(H, W, Cp))

    # ---- conv2: 9 shifted taps, K = Cp each, accumulate in vregs -------------
    y2_list = []
    for n in range(N):
        acc = None
        for dy in range(3):
            for dx in range(3):
                tap = pad_ref[n, dy:dy + H, dx:dx + W, :].reshape(HW, Cp)
                c = jnp.dot(tap, w2_ref[3 * dy + dx],
                            preferred_element_type=jnp.float32)
                acc = c if acc is None else acc + c
        y2_list.append(acc + b2_ref[...])
    y2 = jnp.concatenate(y2_list, axis=0)                              # (N*HW, Cp)

    # ---- BN2 (two-pass) + ReLU ------------------------------------------------
    mean2 = jnp.sum(y2, axis=0, keepdims=True) / count
    var2 = jnp.sum((y2 - mean2) ** 2, axis=0, keepdims=True) / count
    sc2 = g2_ref[...] * jax.lax.rsqrt(var2 + EPS)
    sh2 = be2_ref[...] - mean2 * sc2
    h2 = jnp.maximum(y2 * sc2 + sh2, 0.0)                              # (N*HW, Cp)

    # ---- lane-dense NCHW-style output: per sample (Cout, H*W) -----------------
    for n in range(N):
        block = h2[n * HW:(n + 1) * HW, :]                             # (HW, Cp)
        o_ref[n] = jnp.transpose(block)[0:Cout, :]                     # (Cout, HW)


@jax.jit
def down_forward(x_nchw, params):
    """Forward of `down(in_ch, out_ch)`: x is NCHW, returns NCHW."""
    w1, b1, g1, be1, w2, b2, g2, be2 = params          # w: HWIO, vectors: (Cout,)
    N, Cin, H0, W0 = x_nchw.shape
    H, W = H0 // 2, W0 // 2
    HW = H * W
    Cout = w1.shape[-1]
    Cp = _round_up(Cout, LANE)                         # lane-dense channel dim
    K1 = 9 * Cin
    K1p = _round_up(K1, 8)

    x = x_nchw.astype(jnp.float32)

    # MaxPool2d(2) + im2col for conv1: layout plumbing on a ~4 KB input done by
    # a few tiny XLA ops; gives the kernel one matmul-ready (N*H*W, 9*Cin) slab
    # (SAME-conv zero padding already folded in).
    pooled = jnp.max(x.reshape(N, Cin, H, 2, W, 2), axis=(3, 5))        # (N,Cin,H,W)
    p = jnp.transpose(pooled, (0, 2, 3, 1))                             # (N,H,W,Cin)
    p = jnp.pad(p, ((0, 0), (1, 1), (1, 1), (0, 0)))                    # (N,H+2,W+2,Cin)
    cols = [p[:, dy:dy + H, dx:dx + W, :] for dy in range(3) for dx in range(3)]
    slab = jnp.concatenate(cols, axis=-1).reshape(N * HW, K1)
    slab = jnp.pad(slab, ((0, 0), (0, K1p - K1)))                       # (N*HW, K1p)

    # Parameters padded to the lane width (padded channels stay exactly zero
    # through conv/BN/ReLU because weights/bias/gamma/beta pad with zeros).
    w1r = jnp.pad(w1.astype(jnp.float32).reshape(K1, Cout),
                  ((0, K1p - K1), (0, Cp - Cout)))                      # (K1p, Cp)
    w2r = jnp.pad(w2.astype(jnp.float32),
                  ((0, 0), (0, 0), (0, Cp - Cout), (0, Cp - Cout))
                  ).reshape(9, Cp, Cp)
    b1p = _pad_last(b1, Cp).reshape(1, Cp).astype(jnp.float32)
    b2p = _pad_last(b2, Cp).reshape(1, Cp).astype(jnp.float32)
    g1p = _pad_last(g1, Cp).reshape(1, Cp).astype(jnp.float32)
    be1p = _pad_last(be1, Cp).reshape(1, Cp).astype(jnp.float32)
    g2p = _pad_last(g2, Cp).reshape(1, Cp).astype(jnp.float32)
    be2p = _pad_last(be2, Cp).reshape(1, Cp).astype(jnp.float32)

    vec_spec = pl.BlockSpec((1, Cp), lambda i: (0, 0))
    out = pl.pallas_call(
        down_fused_kernel,
        grid=(1,),
        in_specs=[
            pl.BlockSpec((N * HW, K1p), lambda i: (0, 0)),
            pl.BlockSpec((K1p, Cp), lambda i: (0, 0)),
            vec_spec, vec_spec, vec_spec,
            pl.BlockSpec((9, Cp, Cp), lambda i: (0, 0, 0)),
            vec_spec, vec_spec, vec_spec,
        ],
        out_specs=pl.BlockSpec((N, Cout, HW), lambda i: (0, 0, 0)),
        out_shape=jax.ShapeDtypeStruct((N, Cout, HW), jnp.float32),
        scratch_shapes=[pltpu.VMEM((N, H + 2, W + 2, Cp), jnp.float32)],
        compiler_params=pltpu.CompilerParams(
            dimension_semantics=("arbitrary",),
            vmem_limit_bytes=32 * 1024 * 1024),
        cost_estimate=pl.CostEstimate(
            flops=2 * N * HW * (K1p * Cp + 9 * Cp * Cp),
            transcendentals=2 * Cp,
            bytes_accessed=4 * (N * HW * K1p + K1p * Cp + 9 * Cp * Cp
                                + 8 * Cp + N * Cout * HW)),
    )(slab, w1r, b1p, g1p, be1p, w2r, b2p, g2p, be2p)

    # (N, Cout, H*W) -> (N, Cout, H, W): layout-preserving reshape (no relayout).
    return out.reshape(N, Cout, H, W)


# --------------------------------------------------------------------------
# Parameters & pure-JAX reference
# --------------------------------------------------------------------------
def init_params(key, in_ch, out_ch):
    """Deterministic synthetic parameters (PyTorch-like uniform fan-in init)."""
    k1, k2, k3, k4 = jax.random.split(key, 4)
    s1 = 1.0 / math.sqrt(in_ch * 9)
    s2 = 1.0 / math.sqrt(out_ch * 9)
    w1 = jax.random.uniform(k1, (3, 3, in_ch, out_ch), jnp.float32, -s1, s1)   # HWIO
    b1 = jax.random.uniform(k2, (out_ch,), jnp.float32, -s1, s1)
    w2 = jax.random.uniform(k3, (3, 3, out_ch, out_ch), jnp.float32, -s2, s2)
    b2 = jax.random.uniform(k4, (out_ch,), jnp.float32, -s2, s2)
    g1 = jnp.ones((out_ch,), jnp.float32)
    be1 = jnp.zeros((out_ch,), jnp.float32)
    g2 = jnp.ones((out_ch,), jnp.float32)
    be2 = jnp.zeros((out_ch,), jnp.float32)
    return (w1, b1, g1, be1, w2, b2, g2, be2)


def ref_forward(x_nchw, params):
    """Pure-JAX reference (NHWC conv via lax) for correctness checking."""
    w1, b1, g1, be1, w2, b2, g2, be2 = params
    x = jnp.transpose(x_nchw, (0, 2, 3, 1)).astype(jnp.float32)
    N, H0, W0, Cin = x.shape
    xp = jnp.max(x.reshape(N, H0 // 2, 2, W0 // 2, 2, Cin), axis=(2, 4))

    def conv(h, w, b):
        y = jax.lax.conv_general_dilated(
            h, w, window_strides=(1, 1), padding="SAME",
            dimension_numbers=("NHWC", "HWIO", "NHWC"))
        return y + b

    def bn_relu(y, g, be):
        m = jnp.mean(y, axis=(0, 1, 2), keepdims=True)
        v = jnp.mean((y - m) ** 2, axis=(0, 1, 2), keepdims=True)
        return jnp.maximum((y - m) / jnp.sqrt(v + EPS) * g + be, 0.0)

    h = bn_relu(conv(xp, w1, b1), g1, be1)
    h = bn_relu(conv(h, w2, b2), g2, be2)
    return jnp.transpose(h, (0, 3, 1, 2))


if __name__ == "__main__":
    key = jax.random.PRNGKey(0)
    kx, kp = jax.random.split(key)

    in_ch, out_ch = 4, 8
    x = jax.random.normal(kx, (2, in_ch, 16, 16), jnp.float32)      # NCHW, like PyTorch
    params = init_params(kp, in_ch, out_ch)

    out = jax.block_until_ready(down_forward(x, params))
    ref = jax.block_until_ready(ref_forward(x, params))

    assert out.shape == (2, out_ch, 8, 8), out.shape
    err = float(jnp.max(jnp.abs(out - ref)))
    assert jnp.allclose(out, ref, atol=1e-3, rtol=1e-3), err

    print("KERNEL_OK")
</pallas_src>

<mosaic_0001>
module attributes {stable_mosaic.version = 11 : i64} {
  func.func @down_fused_kernel(%arg0: i32, %arg1: memref<128x40xf32, #tpu.memory_space<vmem>>, %arg2: memref<40x128xf32, #tpu.memory_space<vmem>>, %arg3: memref<1x128xf32, #tpu.memory_space<vmem>>, %arg4: memref<1x128xf32, #tpu.memory_space<vmem>>, %arg5: memref<1x128xf32, #tpu.memory_space<vmem>>, %arg6: memref<9x128x128xf32, #tpu.memory_space<vmem>>, %arg7: memref<1x128xf32, #tpu.memory_space<vmem>>, %arg8: memref<1x128xf32, #tpu.memory_space<vmem>>, %arg9: memref<1x128xf32, #tpu.memory_space<vmem>>, %arg10: memref<2x8x64xf32, #tpu.memory_space<vmem>>, %arg11: memref<2x10x10x128xf32, #tpu.memory_space<vmem>>) attributes {dimension_semantics = [#tpu.dimension_semantics<arbitrary>], iteration_bounds = array<i64: 1>, scalar_prefetch = 0 : i64, scratch_operands = 1 : i64, tpu.core_type = #tpu.core_type<tc>, window_params = [{pipeline_mode = #tpu.pipeline_mode<synchronous>, transform_indices = @transform_0, window_bounds = array<i64: 128, 40>}, {pipeline_mode = #tpu.pipeline_mode<synchronous>, transform_indices = @transform_1, window_bounds = array<i64: 40, 128>}, {pipeline_mode = #tpu.pipeline_mode<synchronous>, transform_indices = @transform_2, window_bounds = array<i64: 1, 128>}, {pipeline_mode = #tpu.pipeline_mode<synchronous>, transform_indices = @transform_3, window_bounds = array<i64: 1, 128>}, {pipeline_mode = #tpu.pipeline_mode<synchronous>, transform_indices = @transform_4, window_bounds = array<i64: 1, 128>}, {pipeline_mode = #tpu.pipeline_mode<synchronous>, transform_indices = @transform_5, window_bounds = array<i64: 9, 128, 128>}, {pipeline_mode = #tpu.pipeline_mode<synchronous>, transform_indices = @transform_6, window_bounds = array<i64: 1, 128>}, {pipeline_mode = #tpu.pipeline_mode<synchronous>, transform_indices = @transform_7, window_bounds = array<i64: 1, 128>}, {pipeline_mode = #tpu.pipeline_mode<synchronous>, transform_indices = @transform_8, window_bounds = array<i64: 1, 128>}, {pipeline_mode = #tpu.pipeline_mode<synchronous>, transform_indices = @transform_9, window_bounds = array<i64: 2, 8, 64>}]} {
    %c0 = arith.constant 0 : index
    %c0_0 = arith.constant 0 : index
    %0 = vector.load %arg1[%c0, %c0_0] : memref<128x40xf32, #tpu.memory_space<vmem>>, vector<128x40xf32>
    %c0_1 = arith.constant 0 : index
    %c0_2 = arith.constant 0 : index
    %1 = vector.load %arg2[%c0_1, %c0_2] : memref<40x128xf32, #tpu.memory_space<vmem>>, vector<40x128xf32>
    %cst = arith.constant dense<0.000000e+00> : vector<128x128xf32>
    %2 = tpu.matmul %0, %1, %cst {dimension_numbers = #tpu.dot_dimension_numbers<[1], [0], [0], [1], [0, 0, 1, 1], [], []>} : vector<128x40xf32>, vector<40x128xf32>, vector<128x128xf32> -> vector<128x128xf32>
    %c0_3 = arith.constant 0 : index
    %c0_4 = arith.constant 0 : index
    %3 = vector.load %arg3[%c0_3, %c0_4] : memref<1x128xf32, #tpu.memory_space<vmem>>, vector<1x128xf32>
    %4 = vector.broadcast %3 : vector<1x128xf32> to vector<128x128xf32>
    %5 = arith.addf %2, %4 : vector<128x128xf32>
    %cst_5 = arith.constant dense<0.000000e+00> : vector<128xf32>
    %6 = vector.multi_reduction <add>, %5, %cst_5 [0] : vector<128x128xf32> to vector<128xf32>
    %7 = vector.shape_cast %6 : vector<128xf32> to vector<1x128xf32>
    %cst_6 = arith.constant 1.280000e+02 : f32
    %8 = vector.broadcast %cst_6 : f32 to vector<1x128xf32>
    %9 = arith.divf %7, %8 : vector<1x128xf32>
    %10 = vector.broadcast %9 : vector<1x128xf32> to vector<128x128xf32>
    %11 = arith.subf %5, %10 : vector<128x128xf32>
    %12 = arith.mulf %11, %11 : vector<128x128xf32>
    %cst_7 = arith.constant dense<0.000000e+00> : vector<128xf32>
    %13 = vector.multi_reduction <add>, %12, %cst_7 [0] : vector<128x128xf32> to vector<128xf32>
    %14 = vector.shape_cast %13 : vector<128xf32> to vector<1x128xf32>
    %cst_8 = arith.constant 1.280000e+02 : f32
    %15 = vector.broadcast %cst_8 : f32 to vector<1x128xf32>
    %16 = arith.divf %14, %15 : vector<1x128xf32>
    %c0_9 = arith.constant 0 : index
    %c0_10 = arith.constant 0 : index
    %17 = vector.load %arg4[%c0_9, %c0_10] : memref<1x128xf32, #tpu.memory_space<vmem>>, vector<1x128xf32>
    %cst_11 = arith.constant 9.99999974E-6 : f32
    %18 = vector.broadcast %cst_11 : f32 to vector<1x128xf32>
    %19 = arith.addf %16, %18 : vector<1x128xf32>
    %20 = math.rsqrt %19 : vector<1x128xf32>
    %21 = arith.mulf %17, %20 : vector<1x128xf32>
    %c0_12 = arith.constant 0 : index
    %c0_13 = arith.constant 0 : index
    %22 = vector.load %arg5[%c0_12, %c0_13] : memref<1x128xf32, #tpu.memory_space<vmem>>, vector<1x128xf32>
    %23 = arith.mulf %9, %21 : vector<1x128xf32>
    %24 = arith.subf %22, %23 : vector<1x128xf32>
    %25 = vector.broadcast %21 : vector<1x128xf32> to vector<128x128xf32>
    %26 = arith.mulf %5, %25 : vector<128x128xf32>
    %27 = vector.broadcast %24 : vector<1x128xf32> to vector<128x128xf32>
    %28 = arith.addf %26, %27 : vector<128x128xf32>
    %cst_14 = arith.constant 0.000000e+00 : f32
    %29 = vector.broadcast %cst_14 : f32 to vector<128x128xf32>
    %30 = arith.maximumf %28, %29 : vector<128x128xf32>
    %cst_15 = arith.constant 0.000000e+00 : f32
    %31 = vector.broadcast %cst_15 : f32 to vector<2x10x10x128xf32>
    %c0_16 = arith.constant 0 : index
    %c0_17 = arith.constant 0 : index
    %c0_18 = arith.constant 0 : index
    %c0_19 = arith.constant 0 : index
    %32 = vector.load %arg11[%c0_16, %c0_17, %c0_18, %c0_19] : memref<2x10x10x128xf32, #tpu.memory_space<vmem>>, vector<2x10x10x128xf32>
    tpu.vector_store %arg11[%c0_16, %c0_17, %c0_18, %c0_19], %31 {strides = array<i32>} : memref<2x10x10x128xf32, #tpu.memory_space<vmem>>, vector<2x10x10x128xf32>,
    %33 = vector.extract_strided_slice %30 {offsets = [0, 0], sizes = [64, 128], strides = [1, 1]} : vector<128x128xf32> to vector<64x128xf32>
    %34 = vector.shape_cast %33 : vector<64x128xf32> to vector<8x8x128xf32>
    %c0_20 = arith.constant 0 : index
    %c1 = arith.constant 1 : index
    %c1_21 = arith.constant 1 : index
    %c0_22 = arith.constant 0 : index
    %35 = vector.load %arg11[%c0_20, %c1, %c1_21, %c0_22] : memref<2x10x10x128xf32, #tpu.memory_space<vmem>>, vector<1x8x8x128xf32>
    %36 = vector.shape_cast %35 : vector<1x8x8x128xf32> to vector<8x8x128xf32>
    %37 = vector.shape_cast %34 : vector<8x8x128xf32> to vector<1x8x8x128xf32>
    tpu.vector_store %arg11[%c0_20, %c1, %c1_21, %c0_22], %37 {strides = array<i32>} : memref<2x10x10x128xf32, #tpu.memory_space<vmem>>, vector<1x8x8x128xf32>,
    %38 = vector.extract_strided_slice %30 {offsets = [64, 0], sizes = [64, 128], strides = [1, 1]} : vector<128x128xf32> to vector<64x128xf32>
    %39 = vector.shape_cast %38 : vector<64x128xf32> to vector<8x8x128xf32>
    %c1_23 = arith.constant 1 : index
    %c1_24 = arith.constant 1 : index
    %c1_25 = arith.constant 1 : index
    %c0_26 = arith.constant 0 : index
    %40 = vector.load %arg11[%c1_23, %c1_24, %c1_25, %c0_26] : memref<2x10x10x128xf32, #tpu.memory_space<vmem>>, vector<1x8x8x128xf32>
    %41 = vector.shape_cast %40 : vector<1x8x8x128xf32> to vector<8x8x128xf32>
    %42 = vector.shape_cast %39 : vector<8x8x128xf32> to vector<1x8x8x128xf32>
    tpu.vector_store %arg11[%c1_23, %c1_24, %c1_25, %c0_26], %42 {strides = array<i32>} : memref<2x10x10x128xf32, #tpu.memory_space<vmem>>, vector<1x8x8x128xf32>,
    %c0_27 = arith.constant 0 : index
    %c0_28 = arith.constant 0 : index
    %c0_29 = arith.constant 0 : index
    %c0_30 = arith.constant 0 : index
    %43 = vector.load %arg11[%c0_27, %c0_28, %c0_29, %c0_30] : memref<2x10x10x128xf32, #tpu.memory_space<vmem>>, vector<1x8x8x128xf32>
    %44 = vector.shape_cast %43 : vector<1x8x8x128xf32> to vector<8x8x128xf32>
    %45 = vector.shape_cast %44 : vector<8x8x128xf32> to vector<64x128xf32>
    %c0_31 = arith.constant 0 : index
    %c0_32 = arith.constant 0 : index
    %c0_33 = arith.constant 0 : index
    %46 = vector.load %arg6[%c0_31, %c0_32, %c0_33] : memref<9x128x128xf32, #tpu.memory_space<vmem>>, vector<1x128x128xf32>
    %47 = vector.shape_cast %46 : vector<1x128x128xf32> to vector<128x128xf32>
    %cst_34 = arith.constant dense<0.000000e+00> : vector<64x128xf32>
    %48 = tpu.matmul %45, %47, %cst_34 {dimension_numbers = #tpu.dot_dimension_numbers<[1], [0], [0], [1], [0, 0, 1, 1], [], []>} : vector<64x128xf32>, vector<128x128xf32>, vector<64x128xf32> -> vector<64x128xf32>
    %c0_35 = arith.constant 0 : index
    %c0_36 = arith.constant 0 : index
    %c1_37 = arith.constant 1 : index
    %c0_38 = arith.constant 0 : index
    %49 = vector.load %arg11[%c0_35, %c0_36, %c1_37, %c0_38] : memref<2x10x10x128xf32, #tpu.memory_space<vmem>>, vector<1x8x8x128xf32>
    %50 = vector.shape_cast %49 : vector<1x8x8x128xf32> to vector<8x8x128xf32>
    %51 = vector.shape_cast %50 : vector<8x8x128xf32> to vector<64x128xf32>
    %c1_39 = arith.constant 1 : index
    %c0_40 = arith.constant 0 : index
    %c0_41 = arith.constant 0 : index
    %52 = vector.load %arg6[%c1_39, %c0_40, %c0_41] : memref<9x128x128xf32, #tpu.memory_space<vmem>>, vector<1x128x128xf32>
    %53 = vector.shape_cast %52 : vector<1x128x128xf32> to vector<128x128xf32>
    %cst_42 = arith.constant dense<0.000000e+00> : vector<64x128xf32>
    %54 = tpu.matmul %51, %53, %cst_42 {dimension_numbers = #tpu.dot_dimension_numbers<[1], [0], [0], [1], [0, 0, 1, 1], [], []>} : vector<64x128xf32>, vector<128x128xf32>, vector<64x128xf32> -> vector<64x128xf32>
    %55 = arith.addf %48, %54 : vector<64x128xf32>
    %c0_43 = arith.constant 0 : index
    %c0_44 = arith.constant 0 : index
    %c2 = arith.constant 2 : index
    %c0_45 = arith.constant 0 : index
    %56 = vector.load %arg11[%c0_43, %c0_44, %c2, %c0_45] : memref<2x10x10x128xf32, #tpu.memory_space<vmem>>, vector<1x8x8x128xf32>
    %57 = vector.shape_cast %56 : vector<1x8x8x128xf32> to vector<8x8x128xf32>
    %58 = vector.shape_cast %57 : vector<8x8x128xf32> to vector<64x128xf32>
    %c2_46 = arith.constant 2 : index
    %c0_47 = arith.constant 0 : index
    %c0_48 = arith.constant 0 : index
    %59 = vector.load %arg6[%c2_46, %c0_47, %c0_48] : memref<9x128x128xf32, #tpu.memory_space<vmem>>, vector<1x128x128xf32>
    %60 = vector.shape_cast %59 : vector<1x128x128xf32> to vector<128x128xf32>
    %cst_49 = arith.constant dense<0.000000e+00> : vector<64x128xf32>
    %61 = tpu.matmul %58, %60, %cst_49 {dimension_numbers = #tpu.dot_dimension_numbers<[1], [0], [0], [1], [0, 0, 1, 1], [], []>} : vector<64x128xf32>, vector<128x128xf32>, vector<64x128xf32> -> vector<64x128xf32>
    %62 = arith.addf %55, %61 : vector<64x128xf32>
    %c0_50 = arith.constant 0 : index
    %c1_51 = arith.constant 1 : index
    %c0_52 = arith.constant 0 : index
    %c0_53 = arith.constant 0 : index
    %63 = vector.load %arg11[%c0_50, %c1_51, %c0_52, %c0_53] : memref<2x10x10x128xf32, #tpu.memory_space<vmem>>, vector<1x8x8x128xf32>
    %64 = vector.shape_cast %63 : vector<1x8x8x128xf32> to vector<8x8x128xf32>
    %65 = vector.shape_cast %64 : vector<8x8x128xf32> to vector<64x128xf32>
    %c3 = arith.constant 3 : index
    %c0_54 = arith.constant 0 : index
    %c0_55 = arith.constant 0 : index
    %66 = vector.load %arg6[%c3, %c0_54, %c0_55] : memref<9x128x128xf32, #tpu.memory_space<vmem>>, vector<1x128x128xf32>
    %67 = vector.shape_cast %66 : vector<1x128x128xf32> to vector<128x128xf32>
    %cst_56 = arith.constant dense<0.000000e+00> : vector<64x128xf32>
    %68 = tpu.matmul %65, %67, %cst_56 {dimension_numbers = #tpu.dot_dimension_numbers<[1], [0], [0], [1], [0, 0, 1, 1], [], []>} : vector<64x128xf32>, vector<128x128xf32>, vector<64x128xf32> -> vector<64x128xf32>
    %69 = arith.addf %62, %68 : vector<64x128xf32>
    %c0_57 = arith.constant 0 : index
    %c1_58 = arith.constant 1 : index
    %c1_59 = arith.constant 1 : index
    %c0_60 = arith.constant 0 : index
    %70 = vector.load %arg11[%c0_57, %c1_58, %c1_59, %c0_60] : memref<2x10x10x128xf32, #tpu.memory_space<vmem>>, vector<1x8x8x128xf32>
    %71 = vector.shape_cast %70 : vector<1x8x8x128xf32> to vector<8x8x128xf32>
    %72 = vector.shape_cast %71 : vector<8x8x128xf32> to vector<64x128xf32>
    %c4 = arith.constant 4 : index
    %c0_61 = arith.constant 0 : index
    %c0_62 = arith.constant 0 : index
    %73 = vector.load %arg6[%c4, %c0_61, %c0_62] : memref<9x128x128xf32, #tpu.memory_space<vmem>>, vector<1x128x128xf32>
    %74 = vector.shape_cast %73 : vector<1x128x128xf32> to vector<128x128xf32>
    %cst_63 = arith.constant dense<0.000000e+00> : vector<64x128xf32>
    %75 = tpu.matmul %72, %74, %cst_63 {dimension_numbers = #tpu.dot_dimension_numbers<[1], [0], [0], [1], [0, 0, 1, 1], [], []>} : vector<64x128xf32>, vector<128x128xf32>, vector<64x128xf32> -> vector<64x128xf32>
    %76 = arith.addf %69, %75 : vector<64x128xf32>
    %c0_64 = arith.constant 0 : index
    %c1_65 = arith.constant 1 : index
    %c2_66 = arith.constant 2 : index
    %c0_67 = arith.constant 0 : index
    %77 = vector.load %arg11[%c0_64, %c1_65, %c2_66, %c0_67] : memref<2x10x10x128xf32, #tpu.memory_space<vmem>>, vector<1x8x8x128xf32>
    %78 = vector.shape_cast %77 : vector<1x8x8x128xf32> to vector<8x8x128xf32>
    %79 = vector.shape_cast %78 : vector<8x8x128xf32> to vector<64x128xf32>
    %c5 = arith.constant 5 : index
    %c0_68 = arith.constant 0 : index
    %c0_69 = arith.constant 0 : index
    %80 = vector.load %arg6[%c5, %c0_68, %c0_69] : memref<9x128x128xf32, #tpu.memory_space<vmem>>, vector<1x128x128xf32>
    %81 = vector.shape_cast %80 : vector<1x128x128xf32> to vector<128x128xf32>
    %cst_70 = arith.constant dense<0.000000e+00> : vector<64x128xf32>
    %82 = tpu.matmul %79, %81, %cst_70 {dimension_numbers = #tpu.dot_dimension_numbers<[1], [0], [0], [1], [0, 0, 1, 1], [], []>} : vector<64x128xf32>, vector<128x128xf32>, vector<64x128xf32> -> vector<64x128xf32>
    %83 = arith.addf %76, %82 : vector<64x128xf32>
    %c0_71 = arith.constant 0 : index
    %c2_72 = arith.constant 2 : index
    %c0_73 = arith.constant 0 : index
    %c0_74 = arith.constant 0 : index
    %84 = vector.load %arg11[%c0_71, %c2_72, %c0_73, %c0_74] : memref<2x10x10x128xf32, #tpu.memory_space<vmem>>, vector<1x8x8x128xf32>
    %85 = vector.shape_cast %84 : vector<1x8x8x128xf32> to vector<8x8x128xf32>
    %86 = vector.shape_cast %85 : vector<8x8x128xf32> to vector<64x128xf32>
    %c6 = arith.constant 6 : index
    %c0_75 = arith.constant 0 : index
    %c0_76 = arith.constant 0 : index
    %87 = vector.load %arg6[%c6, %c0_75, %c0_76] : memref<9x128x128xf32, #tpu.memory_space<vmem>>, vector<1x128x128xf32>
    %88 = vector.shape_cast %87 : vector<1x128x128xf32> to vector<128x128xf32>
    %cst_77 = arith.constant dense<0.000000e+00> : vector<64x128xf32>
    %89 = tpu.matmul %86, %88, %cst_77 {dimension_numbers = #tpu.dot_dimension_numbers<[1], [0], [0], [1], [0, 0, 1, 1], [], []>} : vector<64x128xf32>, vector<128x128xf32>, vector<64x128xf32> -> vector<64x128xf32>
    %90 = arith.addf %83, %89 : vector<64x128xf32>
    %c0_78 = arith.constant 0 : index
    %c2_79 = arith.constant 2 : index
    %c1_80 = arith.constant 1 : index
    %c0_81 = arith.constant 0 : index
    %91 = vector.load %arg11[%c0_78, %c2_79, %c1_80, %c0_81] : memref<2x10x10x128xf32, #tpu.memory_space<vmem>>, vector<1x8x8x128xf32>
    %92 = vector.shape_cast %91 : vector<1x8x8x128xf32> to vector<8x8x128xf32>
    %93 = vector.shape_cast %92 : vector<8x8x128xf32> to vector<64x128xf32>
    %c7 = arith.constant 7 : index
    %c0_82 = arith.constant 0 : index
    %c0_83 = arith.constant 0 : index
    %94 = vector.load %arg6[%c7, %c0_82, %c0_83] : memref<9x128x128xf32, #tpu.memory_space<vmem>>, vector<1x128x128xf32>
    %95 = vector.shape_cast %94 : vector<1x128x128xf32> to vector<128x128xf32>
    %cst_84 = arith.constant dense<0.000000e+00> : vector<64x128xf32>
    %96 = tpu.matmul %93, %95, %cst_84 {dimension_numbers = #tpu.dot_dimension_numbers<[1], [0], [0], [1], [0, 0, 1, 1], [], []>} : vector<64x128xf32>, vector<128x128xf32>, vector<64x128xf32> -> vector<64x128xf32>
    %97 = arith.addf %90, %96 : vector<64x128xf32>
    %c0_85 = arith.constant 0 : index
    %c2_86 = arith.constant 2 : index
    %c2_87 = arith.constant 2 : index
    %c0_88 = arith.constant 0 : index
    %98 = vector.load %arg11[%c0_85, %c2_86, %c2_87, %c0_88] : memref<2x10x10x128xf32, #tpu.memory_space<vmem>>, vector<1x8x8x128xf32>
    %99 = vector.shape_cast %98 : vector<1x8x8x128xf32> to vector<8x8x128xf32>
    %100 = vector.shape_cast %99 : vector<8x8x128xf32> to vector<64x128xf32>
    %c8 = arith.constant 8 : index
    %c0_89 = arith.constant 0 : index
    %c0_90 = arith.constant 0 : index
    %101 = vector.load %arg6[%c8, %c0_89, %c0_90] : memref<9x128x128xf32, #tpu.memory_space<vmem>>, vector<1x128x128xf32>
    %102 = vector.shape_cast %101 : vector<1x128x128xf32> to vector<128x128xf32>
    %cst_91 = arith.constant dense<0.000000e+00> : vector<64x128xf32>
    %103 = tpu.matmul %100, %102, %cst_91 {dimension_numbers = #tpu.dot_dimension_numbers<[1], [0], [0], [1], [0, 0, 1, 1], [], []>} : vector<64x128xf32>, vector<128x128xf32>, vector<64x128xf32> -> vector<64x128xf32>
    %104 = arith.addf %97, %103 : vector<64x128xf32>
    %c0_92 = arith.constant 0 : index
    %c0_93 = arith.constant 0 : index
    %105 = vector.load %arg7[%c0_92, %c0_93] : memref<1x128xf32, #tpu.memory_space<vmem>>, vector<1x128xf32>
    %106 = vector.broadcast %105 : vector<1x128xf32> to vector<64x128xf32>
    %107 = arith.addf %104, %106 : vector<64x128xf32>
    %c1_94 = arith.constant 1 : index
    %c0_95 = arith.constant 0 : index
    %c0_96 = arith.constant 0 : index
    %c0_97 = arith.constant 0 : index
    %108 = vector.load %arg11[%c1_94, %c0_95, %c0_96, %c0_97] : memref<2x10x10x128xf32, #tpu.memory_space<vmem>>, vector<1x8x8x128xf32>
    %109 = vector.shape_cast %108 : vector<1x8x8x128xf32> to vector<8x8x128xf32>
    %110 = vector.shape_cast %109 : vector<8x8x128xf32> to vector<64x128xf32>
    %c0_98 = arith.constant 0 : index
    %c0_99 = arith.constant 0 : index
    %c0_100 = arith.constant 0 : index
    %111 = vector.load %arg6[%c0_98, %c0_99, %c0_100] : memref<9x128x128xf32, #tpu.memory_space<vmem>>, vector<1x128x128xf32>
    %112 = vector.shape_cast %111 : vector<1x128x128xf32> to vector<128x128xf32>
    %cst_101 = arith.constant dense<0.000000e+00> : vector<64x128xf32>
    %113 = tpu.matmul %110, %112, %cst_101 {dimension_numbers = #tpu.dot_dimension_numbers<[1], [0], [0], [1], [0, 0, 1, 1], [], []>} : vector<64x128xf32>, vector<128x128xf32>, vector<64x128xf32> -> vector<64x128xf32>
    %c1_102 = arith.constant 1 : index
    %c0_103 = arith.constant 0 : index
    %c1_104 = arith.constant 1 : index
    %c0_105 = arith.constant 0 : index
    %114 = vector.load %arg11[%c1_102, %c0_103, %c1_104, %c0_105] : memref<2x10x10x128xf32, #tpu.memory_space<vmem>>, vector<1x8x8x128xf32>
    %115 = vector.shape_cast %114 : vector<1x8x8x128xf32> to vector<8x8x128xf32>
    %116 = vector.shape_cast %115 : vector<8x8x128xf32> to vector<64x128xf32>
    %c1_106 = arith.constant 1 : index
    %c0_107 = arith.constant 0 : index
    %c0_108 = arith.constant 0 : index
    %117 = vector.load %arg6[%c1_106, %c0_107, %c0_108] : memref<9x128x128xf32, #tpu.memory_space<vmem>>, vector<1x128x128xf32>
    %118 = vector.shape_cast %117 : vector<1x128x128xf32> to vector<128x128xf32>
    %cst_109 = arith.constant dense<0.000000e+00> : vector<64x128xf32>
    %119 = tpu.matmul %116, %118, %cst_109 {dimension_numbers = #tpu.dot_dimension_numbers<[1], [0], [0], [1], [0, 0, 1, 1], [], []>} : vector<64x128xf32>, vector<128x128xf32>, vector<64x128xf32> -> vector<64x128xf32>
    %120 = arith.addf %113, %119 : vector<64x128xf32>
    %c1_110 = arith.constant 1 : index
    %c0_111 = arith.constant 0 : index
    %c2_112 = arith.constant 2 : index
    %c0_113 = arith.constant 0 : index
    %121 = vector.load %arg11[%c1_110, %c0_111, %c2_112, %c0_113] : memref<2x10x10x128xf32, #tpu.memory_space<vmem>>, vector<1x8x8x128xf32>
    %122 = vector.shape_cast %121 : vector<1x8x8x128xf32> to vector<8x8x128xf32>
    %123 = vector.shape_cast %122 : vector<8x8x128xf32> to vector<64x128xf32>
    %c2_114 = arith.constant 2 : index
    %c0_115 = arith.constant 0 : index
    %c0_116 = arith.constant 0 : index
    %124 = vector.load %arg6[%c2_114, %c0_115, %c0_116] : memref<9x128x128xf32, #tpu.memory_space<vmem>>, vector<1x128x128xf32>
    %125 = vector.shape_cast %124 : vector<1x128x128xf32> to vector<128x128xf32>
    %cst_117 = arith.constant dense<0.000000e+00> : vector<64x128xf32>
    %126 = tpu.matmul %123, %125, %cst_117 {dimension_numbers = #tpu.dot_dimension_numbers<[1], [0], [0], [1], [0, 0, 1, 1], [], []>} : vector<64x128xf32>, vector<128x128xf32>, vector<64x128xf32> -> vector<64x128xf32>
    %127 = arith.addf %120, %126 : vector<64x128xf32>
    %c1_118 = arith.constant 1 : index
    %c1_119 = arith.constant 1 : index
    %c0_120 = arith.constant 0 : index
    %c0_121 = arith.constant 0 : index
    %128 = vector.load %arg11[%c1_118, %c1_119, %c0_120, %c0_121] : memref<2x10x10x128xf32, #tpu.memory_space<vmem>>, vector<1x8x8x128xf32>
    %129 = vector.shape_cast %128 : vector<1x8x8x128xf32> to vector<8x8x128xf32>
    %130 = vector.shape_cast %129 : vector<8x8x128xf32> to vector<64x128xf32>
    %c3_122 = arith.constant 3 : index
    %c0_123 = arith.constant 0 : index
    %c0_124 = arith.constant 0 : index
    %131 = vector.load %arg6[%c3_122, %c0_123, %c0_124] : memref<9x128x128xf32, #tpu.memory_space<vmem>>, vector<1x128x128xf32>
    %132 = vector.shape_cast %131 : vector<1x128x128xf32> to vector<128x128xf32>
    %cst_125 = arith.constant dense<0.000000e+00> : vector<64x128xf32>
    %133 = tpu.matmul %130, %132, %cst_125 {dimension_numbers = #tpu.dot_dimension_numbers<[1], [0], [0], [1], [0, 0, 1, 1], [], []>} : vector<64x128xf32>, vector<128x128xf32>, vector<64x128xf32> -> vector<64x128xf32>
    %134 = arith.addf %127, %133 : vector<64x128xf32>
    %c1_126 = arith.constant 1 : index
    %c1_127 = arith.constant 1 : index
    %c1_128 = arith.constant 1 : index
    %c0_129 = arith.constant 0 : index
    %135 = vector.load %arg11[%c1_126, %c1_127, %c1_128, %c0_129] : memref<2x10x10x128xf32, #tpu.memory_space<vmem>>, vector<1x8x8x128xf32>
    %136 = vector.shape_cast %135 : vector<1x8x8x128xf32> to vector<8x8x128xf32>
    %137 = vector.shape_cast %136 : vector<8x8x128xf32> to vector<64x128xf32>
    %c4_130 = arith.constant 4 : index
    %c0_131 = arith.constant 0 : index
    %c0_132 = arith.constant 0 : index
    %138 = vector.load %arg6[%c4_130, %c0_131, %c0_132] : memref<9x128x128xf32, #tpu.memory_space<vmem>>, vector<1x128x128xf32>
    %139 = vector.shape_cast %138 : vector<1x128x128xf32> to vector<128x128xf32>
    %cst_133 = arith.constant dense<0.000000e+00> : vector<64x128xf32>
    %140 = tpu.matmul %137, %139, %cst_133 {dimension_numbers = #tpu.dot_dimension_numbers<[1], [0], [0], [1], [0, 0, 1, 1], [], []>} : vector<64x128xf32>, vector<128x128xf32>, vector<64x128xf32> -> vector<64x128xf32>
    %141 = arith.addf %134, %140 : vector<64x128xf32>
    %c1_134 = arith.constant 1 : index
    %c1_135 = arith.constant 1 : index
    %c2_136 = arith.constant 2 : index
    %c0_137 = arith.constant 0 : index
    %142 = vector.load %arg11[%c1_134, %c1_135, %c2_136, %c0_137] : memref<2x10x10x128xf32, #tpu.memory_space<vmem>>, vector<1x8x8x128xf32>
    %143 = vector.shape_cast %142 : vector<1x8x8x128xf32> to vector<8x8x128xf32>
    %144 = vector.shape_cast %143 : vector<8x8x128xf32> to vector<64x128xf32>
    %c5_138 = arith.constant 5 : index
    %c0_139 = arith.constant 0 : index
    %c0_140 = arith.constant 0 : index
    %145 = vector.load %arg6[%c5_138, %c0_139, %c0_140] : memref<9x128x128xf32, #tpu.memory_space<vmem>>, vector<1x128x128xf32>
    %146 = vector.shape_cast %145 : vector<1x128x128xf32> to vector<128x128xf32>
    %cst_141 = arith.constant dense<0.000000e+00> : vector<64x128xf32>
    %147 = tpu.matmul %144, %146, %cst_141 {dimension_numbers = #tpu.dot_dimension_numbers<[1], [0], [0], [1], [0, 0, 1, 1], [], []>} : vector<64x128xf32>, vector<128x128xf32>, vector<64x128xf32> -> vector<64x128xf32>
    %148 = arith.addf %141, %147 : vector<64x128xf32>
    %c1_142 = arith.constant 1 : index
    %c2_143 = arith.constant 2 : index
    %c0_144 = arith.constant 0 : index
    %c0_145 = arith.constant 0 : index
    %149 = vector.load %arg11[%c1_142, %c2_143, %c0_144, %c0_145] : memref<2x10x10x128xf32, #tpu.memory_space<vmem>>, vector<1x8x8x128xf32>
    %150 = vector.shape_cast %149 : vector<1x8x8x128xf32> to vector<8x8x128xf32>
    %151 = vector.shape_cast %150 : vector<8x8x128xf32> to vector<64x128xf32>
    %c6_146 = arith.constant 6 : index
    %c0_147 = arith.constant 0 : index
    %c0_148 = arith.constant 0 : index
    %152 = vector.load %arg6[%c6_146, %c0_147, %c0_148] : memref<9x128x128xf32, #tpu.memory_space<vmem>>, vector<1x128x128xf32>
    %153 = vector.shape_cast %152 : vector<1x128x128xf32> to vector<128x128xf32>
    %cst_149 = arith.constant dense<0.000000e+00> : vector<64x128xf32>
    %154 = tpu.matmul %151, %153, %cst_149 {dimension_numbers = #tpu.dot_dimension_numbers<[1], [0], [0], [1], [0, 0, 1, 1], [], []>} : vector<64x128xf32>, vector<128x128xf32>, vector<64x128xf32> -> vector<64x128xf32>
    %155 = arith.addf %148, %154 : vector<64x128xf32>
    %c1_150 = arith.constant 1 : index
    %c2_151 = arith.constant 2 : index
    %c1_152 = arith.constant 1 : index
    %c0_153 = arith.constant 0 : index
    %156 = vector.load %arg11[%c1_150, %c2_151, %c1_152, %c0_153] : memref<2x10x10x128xf32, #tpu.memory_space<vmem>>, vector<1x8x8x128xf32>
    %157 = vector.shape_cast %156 : vector<1x8x8x128xf32> to vector<8x8x128xf32>
    %158 = vector.shape_cast %157 : vector<8x8x128xf32> to vector<64x128xf32>
    %c7_154 = arith.constant 7 : index
    %c0_155 = arith.constant 0 : index
    %c0_156 = arith.constant 0 : index
    %159 = vector.load %arg6[%c7_154, %c0_155, %c0_156] : memref<9x128x128xf32, #tpu.memory_space<vmem>>, vector<1x128x128xf32>
    %160 = vector.shape_cast %159 : vector<1x128x128xf32> to vector<128x128xf32>
    %cst_157 = arith.constant dense<0.000000e+00> : vector<64x128xf32>
    %161 = tpu.matmul %158, %160, %cst_157 {dimension_numbers = #tpu.dot_dimension_numbers<[1], [0], [0], [1], [0, 0, 1, 1], [], []>} : vector<64x128xf32>, vector<128x128xf32>, vector<64x128xf32> -> vector<64x128xf32>
    %162 = arith.addf %155, %161 : vector<64x128xf32>
    %c1_158 = arith.constant 1 : index
    %c2_159 = arith.constant 2 : index
    %c2_160 = arith.constant 2 : index
    %c0_161 = arith.constant 0 : index
    %163 = vector.load %arg11[%c1_158, %c2_159, %c2_160, %c0_161] : memref<2x10x10x128xf32, #tpu.memory_space<vmem>>, vector<1x8x8x128xf32>
    %164 = vector.shape_cast %163 : vector<1x8x8x128xf32> to vector<8x8x128xf32>
    %165 = vector.shape_cast %164 : vector<8x8x128xf32> to vector<64x128xf32>
    %c8_162 = arith.constant 8 : index
    %c0_163 = arith.constant 0 : index
    %c0_164 = arith.constant 0 : index
    %166 = vector.load %arg6[%c8_162, %c0_163, %c0_164] : memref<9x128x128xf32, #tpu.memory_space<vmem>>, vector<1x128x128xf32>
    %167 = vector.shape_cast %166 : vector<1x128x128xf32> to vector<128x128xf32>
    %cst_165 = arith.constant dense<0.000000e+00> : vector<64x128xf32>
    %168 = tpu.matmul %165, %167, %cst_165 {dimension_numbers = #tpu.dot_dimension_numbers<[1], [0], [0], [1], [0, 0, 1, 1], [], []>} : vector<64x128xf32>, vector<128x128xf32>, vector<64x128xf32> -> vector<64x128xf32>
    %169 = arith.addf %162, %168 : vector<64x128xf32>
    %c0_166 = arith.constant 0 : index
    %c0_167 = arith.constant 0 : index
    %170 = vector.load %arg7[%c0_166, %c0_167] : memref<1x128xf32, #tpu.memory_space<vmem>>, vector<1x128xf32>
    %171 = vector.broadcast %170 : vector<1x128xf32> to vector<64x128xf32>
    %172 = arith.addf %169, %171 : vector<64x128xf32>
    %173 = tpu.concatenate %107, %172 in 0 : vector<64x128xf32>, vector<64x128xf32> -> vector<128x128xf32>
    %cst_168 = arith.constant dense<0.000000e+00> : vector<128xf32>
    %174 = vector.multi_reduction <add>, %173, %cst_168 [0] : vector<128x128xf32> to vector<128xf32>
    %175 = vector.shape_cast %174 : vector<128xf32> to vector<1x128xf32>
    %cst_169 = arith.constant 1.280000e+02 : f32
    %176 = vector.broadcast %cst_169 : f32 to vector<1x128xf32>
    %177 = arith.divf %175, %176 : vector<1x128xf32>
    %178 = vector.broadcast %177 : vector<1x128xf32> to vector<128x128xf32>
    %179 = arith.subf %173, %178 : vector<128x128xf32>
    %180 = arith.mulf %179, %179 : vector<128x128xf32>
    %cst_170 = arith.constant dense<0.000000e+00> : vector<128xf32>
    %181 = vector.multi_reduction <add>, %180, %cst_170 [0] : vector<128x128xf32> to vector<128xf32>
    %182 = vector.shape_cast %181 : vector<128xf32> to vector<1x128xf32>
    %cst_171 = arith.constant 1.280000e+02 : f32
    %183 = vector.broadcast %cst_171 : f32 to vector<1x128xf32>
    %184 = arith.divf %182, %183 : vector<1x128xf32>
    %c0_172 = arith.constant 0 : index
    %c0_173 = arith.constant 0 : index
    %185 = vector.load %arg8[%c0_172, %c0_173] : memref<1x128xf32, #tpu.memory_space<vmem>>, vector<1x128xf32>
    %cst_174 = arith.constant 9.99999974E-6 : f32
    %186 = vector.broadcast %cst_174 : f32 to vector<1x128xf32>
    %187 = arith.addf %184, %186 : vector<1x128xf32>
    %188 = math.rsqrt %187 : vector<1x128xf32>
    %189 = arith.mulf %185, %188 : vector<1x128xf32>
    %c0_175 = arith.constant 0 : index
    %c0_176 = arith.constant 0 : index
    %190 = vector.load %arg9[%c0_175, %c0_176] : memref<1x128xf32, #tpu.memory_space<vmem>>, vector<1x128xf32>
    %191 = arith.mulf %177, %189 : vector<1x128xf32>
    %192 = arith.subf %190, %191 : vector<1x128xf32>
    %193 = vector.broadcast %189 : vector<1x128xf32> to vector<128x128xf32>
    %194 = arith.mulf %173, %193 : vector<128x128xf32>
    %195 = vector.broadcast %192 : vector<1x128xf32> to vector<128x128xf32>
    %196 = arith.addf %194, %195 : vector<128x128xf32>
    %cst_177 = arith.constant 0.000000e+00 : f32
    %197 = vector.broadcast %cst_177 : f32 to vector<128x128xf32>
    %198 = arith.maximumf %196, %197 : vector<128x128xf32>
    %199 = vector.extract_strided_slice %198 {offsets = [0, 0], sizes = [64, 128], strides = [1, 1]} : vector<128x128xf32> to vector<64x128xf32>
    %200 = tpu.transpose %199, [1, 0] : vector<64x128xf32> -> vector<128x64xf32>
    %201 = vector.extract_strided_slice %200 {offsets = [0, 0], sizes = [8, 64], strides = [1, 1]} : vector<128x64xf32> to vector<8x64xf32>
    %c0_178 = arith.constant 0 : index
    %c0_179 = arith.constant 0 : index
    %c0_180 = arith.constant 0 : index
    %202 = vector.load %arg10[%c0_178, %c0_179, %c0_180] : memref<2x8x64xf32, #tpu.memory_space<vmem>>, vector<1x8x64xf32>
    %203 = vector.shape_cast %202 : vector<1x8x64xf32> to vector<8x64xf32>
    %204 = vector.shape_cast %201 : vector<8x64xf32> to vector<1x8x64xf32>
    tpu.vector_store %arg10[%c0_178, %c0_179, %c0_180], %204 {strides = array<i32>} : memref<2x8x64xf32, #tpu.memory_space<vmem>>, vector<1x8x64xf32>,
    %205 = vector.extract_strided_slice %198 {offsets = [64, 0], sizes = [64, 128], strides = [1, 1]} : vector<128x128xf32> to vector<64x128xf32>
    %206 = tpu.transpose %205, [1, 0] : vector<64x128xf32> -> vector<128x64xf32>
    %207 = vector.extract_strided_slice %206 {offsets = [0, 0], sizes = [8, 64], strides = [1, 1]} : vector<128x64xf32> to vector<8x64xf32>
    %c1_181 = arith.constant 1 : index
    %c0_182 = arith.constant 0 : index
    %c0_183 = arith.constant 0 : index
    %208 = vector.load %arg10[%c1_181, %c0_182, %c0_183] : memref<2x8x64xf32, #tpu.memory_space<vmem>>, vector<1x8x64xf32>
    %209 = vector.shape_cast %208 : vector<1x8x64xf32> to vector<8x64xf32>
    %210 = vector.shape_cast %207 : vector<8x64xf32> to vector<1x8x64xf32>
    tpu.vector_store %arg10[%c1_181, %c0_182, %c0_183], %210 {strides = array<i32>} : memref<2x8x64xf32, #tpu.memory_space<vmem>>, vector<1x8x64xf32>,
    return
  }
  func.func @transform_0(%arg0: i32) -> (i32, i32) {
    %c0_i32 = arith.constant 0 : i32
    %c0_i32_0 = arith.constant 0 : i32
    %c0_i32_1 = arith.constant 0 : i32
    return %c0_i32, %c0_i32_0 : i32, i32
  }
  func.func @transform_1(%arg0: i32) -> (i32, i32) {
    %c0_i32 = arith.constant 0 : i32
    %c0_i32_0 = arith.constant 0 : i32
    %c0_i32_1 = arith.constant 0 : i32
    return %c0_i32, %c0_i32_0 : i32, i32
  }
  func.func @transform_2(%arg0: i32) -> (i32, i32) {
    %c0_i32 = arith.constant 0 : i32
    %c0_i32_0 = arith.constant 0 : i32
    %c0_i32_1 = arith.constant 0 : i32
    return %c0_i32, %c0_i32_0 : i32, i32
  }
  func.func @transform_3(%arg0: i32) -> (i32, i32) {
    %c0_i32 = arith.constant 0 : i32
    %c0_i32_0 = arith.constant 0 : i32
    %c0_i32_1 = arith.constant 0 : i32
    return %c0_i32, %c0_i32_0 : i32, i32
  }
  func.func @transform_4(%arg0: i32) -> (i32, i32) {
    %c0_i32 = arith.constant 0 : i32
    %c0_i32_0 = arith.constant 0 : i32
    %c0_i32_1 = arith.constant 0 : i32
    return %c0_i32, %c0_i32_0 : i32, i32
  }
  func.func @transform_5(%arg0: i32) -> (i32, i32, i32) {
    %c0_i32 = arith.constant 0 : i32
    %c0_i32_0 = arith.constant 0 : i32
    %c0_i32_1 = arith.constant 0 : i32
    %c0_i32_2 = arith.constant 0 : i32
    return %c0_i32, %c0_i32_0, %c0_i32_1 : i32, i32, i32
  }
  func.func @transform_6(%arg0: i32) -> (i32, i32) {
    %c0_i32 = arith.constant 0 : i32
    %c0_i32_0 = arith.constant 0 : i32
    %c0_i32_1 = arith.constant 0 : i32
    return %c0_i32, %c0_i32_0 : i32, i32
  }
  func.func @transform_7(%arg0: i32) -> (i32, i32) {
    %c0_i32 = arith.constant 0 : i32
    %c0_i32_0 = arith.constant 0 : i32
    %c0_i32_1 = arith.constant 0 : i32
    return %c0_i32, %c0_i32_0 : i32, i32
  }
  func.func @transform_8(%arg0: i32) -> (i32, i32) {
    %c0_i32 = arith.constant 0 : i32
    %c0_i32_0 = arith.constant 0 : i32
    %c0_i32_1 = arith.constant 0 : i32
    return %c0_i32, %c0_i32_0 : i32, i32
  }
  func.func @transform_9(%arg0: i32) -> (i32, i32, i32) {
    %c0_i32 = arith.constant 0 : i32
    %c0_i32_0 = arith.constant 0 : i32
    %c0_i32_1 = arith.constant 0 : i32
    %c0_i32_2 = arith.constant 0 : i32
    return %c0_i32, %c0_i32_0, %c0_i32_1 : i32, i32, i32
  }
}

</mosaic_0001>

<bundles_post_ra>
// kernel: down_forward.1
= control target key start
LH: loop header
LB: loop body
LE: loop exit
PB: predicated region body
PF: predicated region fallthrough
CT: control target
= control target key end

     0   :  { %vm60_vm0 = vcmask 326656   ;;  %v5141_v44 = vmov 0.0   ;;  %vm2955_vm1 = vcmask 523264   ;;  %s6264_s1 = inlined_call_operand.vmem [shape: f32[40,128], index: 1, kind: input, shape index: {}]   ;;  %s6265_s0 = inlined_call_operand.vmem [shape: f32[128,40], index: 0, kind: input, shape index: {}]   ;;  %s6266_s5 = inlined_call_operand.vmem [shape: f32[9,128,128], index: 5, kind: input, shape index: {}]   ;;  %s6267_s2 = inlined_call_operand.vmem [shape: f32[1,128], index: 2, kind: input, shape index: {}]   ;;  %s6268_s3 = inlined_call_operand.vmem [shape: f32[1,128], index: 3, kind: input, shape index: {}]   ;;  %s6269_s4 = inlined_call_operand.vmem [shape: f32[1,128], index: 4, kind: input, shape index: {}]   ;;  %s6270_s6 = inlined_call_operand.vmem [shape: f32[1,128], index: 6, kind: input, shape index: {}]   ;;  %s6271_s7 = inlined_call_operand.vmem [shape: f32[1,128], index: 7, kind: input, shape index: {}]   ;;  %s6272_s8 = inlined_call_operand.vmem [shape: f32[1,128], index: 8, kind: input, shape index: {}]   ;;  %s6273_s9 = inlined_call_operand.vmem [shape: f32[2,8,64], index: 9, kind: output, shape index: {}]  }
   0x1   :  { %v48_v0 = vld [vmem:[%s6264_s1] sm:$0xff]  ;;  %v49_v1 = vld [vmem:[%s6264_s1 + $0x8] sm:$0xff]  ;;  %v50_v2 = vld [vmem:[%s6264_s1 + $0x10] sm:$0xff]  ;;  %432 = vst [vmem:[#allocation2 + $0x110] sm:$0xff] %v5141_v44 }
   0x2   :  { %v4421_v3 = vpack.c.bf16 %v49_v1, %v48_v0  ;;  %v51_v4 = vld [vmem:[%s6264_s1 + $0x18] sm:$0xff]  ;;  %v32_v5 = vld [vmem:[%s6265_s0] sm:$0xff]  ;;  %v33_v8 = vld [vmem:[%s6265_s0 + $0x8] sm:$0xff]  ;;  %433 = vst [vmem:[#allocation2 + $0x118] sm:$0x3] %v5141_v44 }
   0x3   :  { %v4425_v6 = vpack.c.bf16 %v51_v4, %v50_v2  ;;  %3605 = vmatprep.mubr.msk.f32.mxu0 %vm60_vm0, %v32_v5  ;;  %v52_v7 = vld [vmem:[%s6264_s1 + $0x20] sm:$0xff]  ;;  %v34_v9 = vld [vmem:[%s6265_s0 + $0x10] sm:$0xff]  ;;  %v35_v10 = vld [vmem:[%s6265_s0 + $0x18] sm:$0xff]  ;;  %398 = vst [vmem:[#allocation2] sm:$0xff] %v5141_v44 }
   0x4   :  { %4422 = vmatprep.subr.bf16.mxu0 %v4421_v3  ;;  %v36_v11 = vld [vmem:[%s6265_s0 + $0x20] sm:$0xff]  ;;  %v37_v12 = vld [vmem:[%s6265_s0 + $0x28] sm:$0xff]  ;;  %v38_v13 = vld [vmem:[%s6265_s0 + $0x30] sm:$0xff]  ;;  %399 = vst [vmem:[#allocation2 + $0x8] sm:$0x3] %v5141_v44 }
   0x5   :  { %4424 = vmatpush3.bf16.msra.mxu0 %v4421_v3  ;;  %v39_v14 = vld [vmem:[%s6265_s0 + $0x38] sm:$0xff]  ;;  %v40_v15 = vld [vmem:[%s6265_s0 + $0x40] sm:$0xff]  ;;  %v41_v16 = vld [vmem:[%s6265_s0 + $0x48] sm:$0xff]  ;;  %400 = vst [vmem:[#allocation2 + $0x10] sm:$0xff] %v5141_v44 }
   0x6   :  { %4426 = vmatprep.subr.bf16.mxu0 %v4425_v6  ;;  %v42_v17 = vld [vmem:[%s6265_s0 + $0x50] sm:$0xff]  ;;  %v43_v18 = vld [vmem:[%s6265_s0 + $0x58] sm:$0xff]  ;;  %v44_v19 = vld [vmem:[%s6265_s0 + $0x60] sm:$0xff]  ;;  %401 = vst [vmem:[#allocation2 + $0x18] sm:$0x3] %v5141_v44 }
   0x7   :  { %v45_v20 = vld [vmem:[%s6265_s0 + $0x68] sm:$0xff]  ;;  %v46_v21 = vld [vmem:[%s6265_s0 + $0x70] sm:$0xff]  ;;  %v47_v22 = vld [vmem:[%s6265_s0 + $0x78] sm:$0xff]  ;;  %402 = vst [vmem:[#allocation2 + $0x20] sm:$0xff] %v5141_v44 }
   0x8   :  { %v3012_v23 = vld [vmem:[%s6266_s5 + $0x80] sm:$0xff]  ;;  %v3013_v24 = vld [vmem:[%s6266_s5 + $0x88] sm:$0xff]  ;;  %v3014_v26 = vld [vmem:[%s6266_s5 + $0x90] sm:$0xff]  ;;  %403 = vst [vmem:[#allocation2 + $0x28] sm:$0x3] %v5141_v44 }
   0x9   :  { %4428 = vmatpush3.bf16.msra.mxu0 %v4425_v6  ;;  %v4429_v25 = vpack.c.bf16 %v3013_v24, %v3012_v23  ;;  %v3015_v27 = vld [vmem:[%s6266_s5 + $0x98] sm:$0xff]  ;;  %v3016_v29 = vld [vmem:[%s6266_s5 + $0xa0] sm:$0xff]  ;;  %v3017_v30 = vld [vmem:[%s6266_s5 + $0xa8] sm:$0xff]  ;;  %404 = vst [vmem:[#allocation2 + $0x30] sm:$0xff] %v5141_v44 }
   0xa   :  { %3603 = vmatprep.subr.mxu0 %v52_v7  ;;  %v4433_v28 = vpack.c.bf16 %v3015_v27, %v3014_v26  ;;  %v4437_v31 = vpack.c.bf16 %v3017_v30, %v3016_v29  ;;  %v3018_v32 = vld [vmem:[%s6266_s5 + $0xb0] sm:$0xff]  ;;  %v3019_v33 = vld [vmem:[%s6266_s5 + $0xb8] sm:$0xff]  ;;  %v3020_v35 = vld [vmem:[%s6266_s5 + $0xc0] sm:$0xff]  ;;  %405 = vst [vmem:[#allocation2 + $0x38] sm:$0x3] %v5141_v44 }
   0xb   :  { %4430 = vmatprep.subr.bf16.mxu1 %v4429_v25  ;;  %v4441_v34 = vpack.c.bf16 %v3019_v33, %v3018_v32  ;;  %v3021_v36 = vld [vmem:[%s6266_s5 + $0xc8] sm:$0xff]  ;;  %v3022_v38 = vld [vmem:[%s6266_s5 + $0xd0] sm:$0xff]  ;;  %v3023_v39 = vld [vmem:[%s6266_s5 + $0xd8] sm:$0xff]  ;;  %406 = vst [vmem:[#allocation2 + $0x40] sm:$0xff] %v5141_v44 }
   0xc   :  { %4432 = vmatpush3.bf16.msra.mxu1 %v4429_v25  ;;  %v4445_v37 = vpack.c.bf16 %v3021_v36, %v3020_v35  ;;  %v4449_v40 = vpack.c.bf16 %v3023_v39, %v3022_v38  ;;  %v3024_v41 = vld [vmem:[%s6266_s5 + $0xe0] sm:$0xff]  ;;  %v3025_v42 = vld [vmem:[%s6266_s5 + $0xe8] sm:$0xff]  ;;  %407 = vst [vmem:[#allocation2 + $0x48] sm:$0x3] %v5141_v44  ;;  %408 = vst [vmem:[#allocation2 + $0x50] sm:$0xff] %v5141_v44 }
   0xd   :  { %3604 = vmatpush3.msra.mxu0 %v52_v7  ;;  %4434 = vmatprep.subr.bf16.mxu1 %v4433_v28  ;;  %v4453_v43 = vpack.c.bf16 %v3025_v42, %v3024_v41  ;;  %409 = vst [vmem:[#allocation2 + $0x58] sm:$0x3] %v5141_v44  ;;  %410 = vst [vmem:[#allocation2 + $0x60] sm:$0xff] %v5141_v44  ;;  %v3026_v45 = vld [vmem:[%s6266_s5 + $0xf0] sm:$0xff]  ;;  %v3027_v46 = vld [vmem:[%s6266_s5 + $0xf8] sm:$0xff] }
   0xe   :  { %3606 = vmatmul.mubr.msk.f32.vlgmr.msra.gmra.mrb[0].mxu0 %vm60_vm0, %v33_v8  ;;  %4718 = vmatprep.subr.bf16.mxu0 %v4429_v25  ;;  %411 = vst [vmem:[#allocation2 + $0x68] sm:$0x3] %v5141_v44  ;;  %412 = vst [vmem:[#allocation2 + $0x70] sm:$0xff] %v5141_v44  ;;  %v4457_v47 = vpack.c.bf16 %v3027_v46, %v3026_v45  ;;  %v464_v48 = vld [vmem:[%s6266_s5] sm:$0xff]  ;;  %v465_v49 = vld [vmem:[%s6266_s5 + $0x8] sm:$0xff] }
   0xf   :  { %3608 = vmatprep.mubr.msk.f32.mxu0 %vm60_vm0, %v34_v9  ;;  %4720 = vmatpush3.bf16.msra.mxu0 %v4429_v25  ;;  %413 = vst [vmem:[#allocation2 + $0x78] sm:$0x3] %v5141_v44  ;;  %414 = vst [vmem:[#allocation2 + $0x80] sm:$0xff] %v5141_v44  ;;  %v5365_v50 = vpack.c.bf16 %v465_v49, %v464_v48  ;;  %v480_v51 = vld [vmem:[#allocation2 + $0x1] sm:$0xff]  ;;  %v2995_v53 = vld [vmem:[%s6267_s2] ss:$0 sm:$0xff] }
  0x10   :  { %4722 = vmatprep.subr.bf16.mxu0 %v4433_v28  ;;  %4436 = vmatpush3.bf16.msra.mxu1 %v4433_v28  ;;  %415 = vst [vmem:[#allocation2 + $0x88] sm:$0x3] %v5141_v44  ;;  %416 = vst [vmem:[#allocation2 + $0x90] sm:$0xff] %v5141_v44 }
  0x11   :  { %4438 = vmatprep.subr.bf16.mxu1 %v4437_v31  ;;  %417 = vst [vmem:[#allocation2 + $0x98] sm:$0x3] %v5141_v44  ;;  %418 = vst [vmem:[#allocation2 + $0xa0] sm:$0xff] %v5141_v44  ;;  %3661 = vmatprep.mubr.f32.mxu1 %v480_v51 }
  0x12   :  { %3609 = vmatmul.mubr.msk.f32.gmra.mrb[2].mxu0 %vm60_vm0, %v35_v10  ;;  %419 = vst [vmem:[#allocation2 + $0xa8] sm:$0x3] %v5141_v44  ;;  %420 = vst [vmem:[#allocation2 + $0xb0] sm:$0xff] %v5141_v44 }
  0x13   :  { %3611 = vmatprep.mubr.msk.f32.mxu0 %vm60_vm0, %v36_v11  ;;  %4724 = vmatpush3.bf16.msra.mxu0 %v4433_v28  ;;  %421 = vst [vmem:[#allocation2 + $0xb8] sm:$0x3] %v5141_v44  ;;  %422 = vst [vmem:[#allocation2 + $0xc0] sm:$0xff] %v5141_v44 }
  0x14   :  { %4726 = vmatprep.subr.bf16.mxu0 %v4437_v31  ;;  %4440 = vmatpush3.bf16.msra.mxu1 %v4437_v31  ;;  %423 = vst [vmem:[#allocation2 + $0xc8] sm:$0x3] %v5141_v44  ;;  %424 = vst [vmem:[#allocation2 + $0xd0] sm:$0xff] %v5141_v44 }
  0x15   :  { %4442 = vmatprep.subr.bf16.mxu1 %v4441_v34  ;;  %425 = vst [vmem:[#allocation2 + $0xd8] sm:$0x3] %v5141_v44  ;;  %426 = vst [vmem:[#allocation2 + $0xe0] sm:$0xff] %v5141_v44 }
  0x16   :  { %3612 = vmatmul.mubr.msk.f32.gmra.mrb[4].mxu0 %vm60_vm0, %v37_v12  ;;  %427 = vst [vmem:[#allocation2 + $0xe8] sm:$0x3] %v5141_v44  ;;  %428 = vst [vmem:[#allocation2 + $0xf0] sm:$0xff] %v5141_v44 }
  0x17   :  { %3614 = vmatprep.mubr.msk.f32.mxu0 %vm60_vm0, %v38_v13  ;;  %4728 = vmatpush3.bf16.msra.mxu0 %v4437_v31  ;;  %429 = vst [vmem:[#allocation2 + $0xf8] sm:$0x3] %v5141_v44  ;;  %430 = vst [vmem:[#allocation2 + $0x100] sm:$0xff] %v5141_v44 }
  0x18   :  { %4730 = vmatprep.subr.bf16.mxu0 %v4441_v34  ;;  %4444 = vmatpush3.bf16.msra.mxu1 %v4441_v34  ;;  %431 = vst [vmem:[#allocation2 + $0x108] sm:$0x3] %v5141_v44  ;;  %434 = vst [vmem:[#allocation2 + $0x120] sm:$0xff] %v5141_v44 }
  0x19   :  { %4446 = vmatprep.subr.bf16.mxu1 %v4445_v37  ;;  %435 = vst [vmem:[#allocation2 + $0x128] sm:$0x3] %v5141_v44  ;;  %436 = vst [vmem:[#allocation2 + $0x130] sm:$0xff] %v5141_v44  ;;  %v1706_v52 = vld [vmem:[#allocation2 + $0xa1] sm:$0xff] }
  0x1a   :  { %3615 = vmatmul.mubr.msk.f32.gmra.mrb[6].mxu0 %vm60_vm0, %v39_v14  ;;  %437 = vst [vmem:[#allocation2 + $0x138] sm:$0x3] %v5141_v44 }
  0x1b   :  { %3617 = vmatprep.mubr.msk.f32.mxu0 %vm60_vm0, %v40_v15  ;;  %4732 = vmatpush3.bf16.msra.mxu0 %v4441_v34 }
  0x1c   :  { %4734 = vmatprep.subr.bf16.mxu0 %v4445_v37  ;;  %4448 = vmatpush3.bf16.msra.mxu1 %v4445_v37 }
  0x1d   :  { %4450 = vmatprep.subr.bf16.mxu1 %v4449_v40 }
  0x1e   :  { %3618 = vmatmul.mubr.msk.f32.gmra.mrb[8].mxu0 %vm60_vm0, %v41_v16 }
  0x1f   :  { %3620 = vmatprep.mubr.msk.f32.mxu0 %vm60_vm0, %v42_v17  ;;  %4736 = vmatpush3.bf16.msra.mxu0 %v4445_v37 }
  0x20   :  { %4738 = vmatprep.subr.bf16.mxu0 %v4449_v40  ;;  %4452 = vmatpush3.bf16.msra.mxu1 %v4449_v40 }
  0x21   :  { %4454 = vmatprep.subr.bf16.mxu1 %v4453_v43 }
  0x22   :  { %3621 = vmatmul.mubr.msk.f32.gmra.mrb[10].mxu0 %vm60_vm0, %v43_v18 }
  0x23   :  { %3623 = vmatprep.mubr.msk.f32.mxu0 %vm60_vm0, %v44_v19  ;;  %4740 = vmatpush3.bf16.msra.mxu0 %v4449_v40 }
  0x24   :  { %4742 = vmatprep.subr.bf16.mxu0 %v4453_v43  ;;  %4456 = vmatpush3.bf16.msra.mxu1 %v4453_v43 }
  0x25   :  { %4458 = vmatprep.subr.bf16.mxu1 %v4457_v47 }
  0x26   :  { %3624 = vmatmul.mubr.msk.f32.gmra.mrb[12].mxu0 %vm60_vm0, %v45_v20 }
  0x27   :  { %3626 = vmatprep.mubr.msk.f32.mxu0 %vm60_vm0, %v46_v21  ;;  %4744 = vmatpush3.bf16.msra.mxu0 %v4453_v43 }
  0x28   :  { %4746 = vmatprep.subr.bf16.mxu0 %v4457_v47  ;;  %4460 = vmatpush3.bf16.msra.mxu1 %v4457_v47 }
  0x29   :  { %4462 = vmatprep.subr.bf16.mxu1 %v5365_v50 }
  0x2a   :  { %3627 = vmatmul.mubr.msk.f32.gmra.mrb[14].mxu0 %vm60_vm0, %v47_v22 }
  0x2b   :  { %4748 = vmatpush3.bf16.msra.mxu0 %v4457_v47  ;;  %4057 = vmatprep.mubr.f32.mxu0 %v1706_v52 }
  0x2c   :  { %4750 = vmatprep.subr.bf16.mxu0 %v5365_v50 }
  0xe1   :  { %v3607_v54 = vpop.f32.mrb[0].mxu0 }
  0xe2   :  { %v175_v55 = vpop.f32.mrb[1].mxu0  ;;  %v5372_v56 = vadd.f32 %v3607_v54, %v2995_v53 }
  0xe3   :  { %v5374_v57 = vadd.f32 %v2995_v53, %v175_v55 }
  0xe5   :  { %v3610_v58 = vpop.f32.mrb[2].mxu0  ;;  %v254_v60 = vadd.f32 %v5372_v56, %v5374_v57 }
  0xe6   :  { %v185_v59 = vpop.f32.mrb[3].mxu0  ;;  %v5380_v62 = vadd.f32 %v3610_v58, %v2995_v53 }
  0xe7   :  { %v5378_v61 = vadd.f32 %v2995_v53, %v185_v59 }
  0xe9   :  { %v255_v63 = vadd.f32 %v254_v60, %v5378_v61  ;;  %v3613_v0 = vpop.f32.mrb[4].mxu0 }
  0xea   :  { %v195_v1 = vpop.f32.mrb[5].mxu0  ;;  %v5386_v4 = vadd.f32 %v3613_v0, %v2995_v53 }
  0xeb   :  { %v5383_v2 = vadd.f32 %v2995_v53, %v195_v1  ;;  %v256_v3 = vadd.f32 %v255_v63, %v5380_v62 }
  0xed   :  { %v257_v5 = vadd.f32 %v256_v3, %v5383_v2  ;;  %v3616_v6 = vpop.f32.mrb[6].mxu0 }
  0xee   :  { %v205_v7 = vpop.f32.mrb[7].mxu0  ;;  %v5392_v10 = vadd.f32 %v3616_v6, %v2995_v53 }
  0xef   :  { %v5389_v8 = vadd.f32 %v2995_v53, %v205_v7  ;;  %v258_v9 = vadd.f32 %v257_v5, %v5386_v4 }
  0xf1   :  { %v259_v11 = vadd.f32 %v258_v9, %v5389_v8  ;;  %v3619_v12 = vpop.f32.mrb[8].mxu0 }
  0xf2   :  { %v215_v13 = vpop.f32.mrb[9].mxu0  ;;  %v5398_v16 = vadd.f32 %v3619_v12, %v2995_v53 }
  0xf3   :  { %v5395_v14 = vadd.f32 %v2995_v53, %v215_v13  ;;  %v260_v15 = vadd.f32 %v259_v11, %v5392_v10 }
  0xf5   :  { %v261_v17 = vadd.f32 %v260_v15, %v5395_v14  ;;  %v3622_v18 = vpop.f32.mrb[10].mxu0 }
  0xf6   :  { %v225_v19 = vpop.f32.mrb[11].mxu0  ;;  %v5404_v22 = vadd.f32 %v3622_v18, %v2995_v53 }
  0xf7   :  { %v5401_v20 = vadd.f32 %v2995_v53, %v225_v19  ;;  %v262_v21 = vadd.f32 %v261_v17, %v5398_v16 }
  0xf9   :  { %v263_v23 = vadd.f32 %v262_v21, %v5401_v20  ;;  %v3625_v24 = vpop.f32.mrb[12].mxu0 }
  0xfa   :  { %v235_v25 = vpop.f32.mrb[13].mxu0  ;;  %v5410_v28 = vadd.f32 %v3625_v24, %v2995_v53 }
  0xfb   :  { %v5407_v26 = vadd.f32 %v2995_v53, %v235_v25  ;;  %v264_v27 = vadd.f32 %v263_v23, %v5404_v22 }
  0xfd   :  { %v265_v29 = vadd.f32 %v264_v27, %v5407_v26  ;;  %v3628_v30 = vpop.f32.mrb[14].mxu0 }
  0xfe   :  { %v245_v31 = vpop.f32.mrb[15].mxu0  ;;  %v5416_v34 = vadd.f32 %v3628_v30, %v2995_v53 }
  0xff   :  { %v5413_v32 = vadd.f32 %v2995_v53, %v245_v31  ;;  %v266_v33 = vadd.f32 %v265_v29, %v5410_v28 }
 0x101   :  { %v267_v35 = vadd.f32 %v266_v33, %v5413_v32 }
 0x103   :  { %v268_v36 = vadd.f32 %v267_v35, %v5416_v34 }
 0x105   :  { %v269_v37 = vrot.slane %v268_v36, 4 }
 0x107   :  { %v270_v38 = vadd.f32 %v269_v37, %v268_v36 }
 0x109   :  { %v271_v39 = vrot.slane %v270_v38, 2 }
 0x10b   :  { %v272_v40 = vadd.f32 %v271_v39, %v270_v38 }
 0x10d   :  { %v273_v41 = vrot.slane %v272_v40, 1 }
 0x10f   :  { %v274_v42 = vadd.f32 %v273_v41, %v272_v40 }
 0x111   :  { %v5420_v43 = vmul.f32 0.0078125, %v274_v42 }
 0x113   :  { %v277_v45 = vsub.f32 %v5374_v57, %v5420_v43  ;;  %v278_v46 = vsub.f32 %v5372_v56, %v5420_v43  ;;  %v279_v47 = vsub.f32 %v5378_v61, %v5420_v43  ;;  %v280_v51 = vsub.f32 %v5380_v62, %v5420_v43 }
 0x114   :  { %v281_v52 = vsub.f32 %v5383_v2, %v5420_v43  ;;  %v282_v55 = vsub.f32 %v5386_v4, %v5420_v43  ;;  %v283_v60 = vsub.f32 %v5389_v8, %v5420_v43  ;;  %v284_v1 = vsub.f32 %v5392_v10, %v5420_v43 }
 0x115   :  { %v293_v48 = vmul.f32 %v277_v45, %v277_v45  ;;  %v294_v49 = vmul.f32 %v278_v46, %v278_v46  ;;  %v295_v53 = vmul.f32 %v279_v47, %v279_v47  ;;  %v296_v58 = vmul.f32 %v280_v51, %v280_v51 }
 0x116   :  { %v297_v63 = vmul.f32 %v281_v52, %v281_v52  ;;  %v298_v3 = vmul.f32 %v282_v55, %v282_v55  ;;  %v285_v6 = vsub.f32 %v5395_v14, %v5420_v43  ;;  %v299_v7 = vmul.f32 %v283_v60, %v283_v60  ;;  %v331_v60 = vld [vmem:[%s6268_s3] sm:$0x1] }
 0x117   :  { %v309_v54 = vadd.f32 %v294_v49, %v293_v48  ;;  %v286_v11 = vsub.f32 %v5398_v16, %v5420_v43  ;;  %v300_v12 = vmul.f32 %v284_v1, %v284_v1  ;;  %v287_v15 = vsub.f32 %v5401_v20, %v5420_v43  ;;  %v466_v1 = vld [vmem:[%s6266_s5 + $0x10] sm:$0xff] }
 0x118   :  { %v301_v17 = vmul.f32 %v285_v6, %v285_v6  ;;  %v288_v19 = vsub.f32 %v5404_v22, %v5420_v43  ;;  %v289_v24 = vsub.f32 %v5407_v26, %v5420_v43  ;;  %v290_v29 = vsub.f32 %v5410_v28, %v5420_v43  ;;  %v468_v6 = vld [vmem:[%s6266_s5 + $0x20] sm:$0xff] }
 0x119   :  { %v310_v59 = vadd.f32 %v309_v54, %v295_v53  ;;  %v302_v21 = vmul.f32 %v286_v11, %v286_v11  ;;  %v303_v25 = vmul.f32 %v287_v15, %v287_v15  ;;  %v291_v33 = vsub.f32 %v5413_v32, %v5420_v43 }
 0x11a   :  { %v304_v30 = vmul.f32 %v288_v19, %v288_v19  ;;  %v305_v35 = vmul.f32 %v289_v24, %v289_v24  ;;  %v292_v37 = vsub.f32 %v5416_v34, %v5420_v43  ;;  %v306_v38 = vmul.f32 %v290_v29, %v290_v29 }
 0x11b   :  { %v311_v0 = vadd.f32 %v310_v59, %v296_v58  ;;  %v307_v40 = vmul.f32 %v291_v33, %v291_v33  ;;  %v339_v58 = vlaneseq }
 0x11c   :  { %v308_v42 = vmul.f32 %v292_v37, %v292_v37 }
 0x11d   :  { %v312_v5 = vadd.f32 %v311_v0, %v297_v63  ;;  %v340_v59 = vshrl.u32 %v339_v58, 7  ;;  %v471_v58 = vld [vmem:[%s6266_s5 + $0x38] sm:$0xff] }
 0x11f   :  { %v313_v9 = vadd.f32 %v312_v5, %v298_v3  ;;  %v5457_v63 = vsub.s32 0, %v340_v59  ;;  %v467_v5 = vld [vmem:[%s6266_s5 + $0x18] sm:$0xff] }
 0x121   :  { %v314_v13 = vadd.f32 %v313_v9, %v299_v7  ;;  %v469_v7 = vld [vmem:[%s6266_s5 + $0x28] sm:$0xff]  ;;  %v335_v9 = vld [vmem:[%s6269_s4] sm:$0x1] }
 0x122   :  { %v5480_v15 = vpack.c.bf16 %v469_v7, %v468_v6  ;;  %v474_v7 = vld [vmem:[%s6266_s5 + $0x50] sm:$0xff] }
 0x123   :  { %v315_v18 = vadd.f32 %v314_v13, %v300_v12  ;;  %v5478_v13 = vpack.c.bf16 %v467_v5, %v466_v1  ;;  %v472_v1 = vld [vmem:[%s6266_s5 + $0x40] sm:$0xff] }
 0x125   :  { %v316_v23 = vadd.f32 %v315_v18, %v301_v17 }
 0x127   :  { %v317_v27 = vadd.f32 %v316_v23, %v302_v21 }
 0x129   :  { %v318_v31 = vadd.f32 %v317_v27, %v303_v25 }
 0x12b   :  { %v319_v36 = vadd.f32 %v318_v31, %v304_v30 }
 0x12d   :  { %v320_v39 = vadd.f32 %v319_v36, %v305_v35 }
 0x12f   :  { %v321_v41 = vadd.f32 %v320_v39, %v306_v38 }
 0x131   :  { %v322_v45 = vadd.f32 %v321_v41, %v307_v40 }
 0x133   :  { %v323_v46 = vadd.f32 %v322_v45, %v308_v42 }
 0x135   :  { %v324_v47 = vrot.slane %v323_v46, 4 }
 0x137   :  { %v325_v48 = vadd.f32 %v324_v47, %v323_v46 }
 0x139   :  { %v326_v49 = vrot.slane %v325_v48, 2 }
 0x13b   :  { %v327_v51 = vadd.f32 %v326_v49, %v325_v48 }
 0x13d   :  { %v328_v52 = vrot.slane %v327_v51, 1 }
 0x13f   :  { %v329_v53 = vadd.f32 %v328_v52, %v327_v51 }
 0x141   :  { %v330_v54 = vmul.f32 0.0078125, %v329_v53 }
 0x143   :  { %v332_v55 = vadd.f32 1e-05, %v330_v54 }
 0x145   :  { %5134 = vrsqrt.f32 %v332_v55 }
 0x14f   :  { %v5135_v0 = vpop.eup %5134 }
 0x150   :  { %v334_v3 = vmul.f32 %v5135_v0, %v331_v60 }
 0x152   :  { %v336_v11 = vmul.f32 %v334_v3, %v5420_v43  ;;  %v5476_v12 = vrot.slane %v334_v3, %v5457_v63  ;;  %v473_v3 = vld [vmem:[%s6266_s5 + $0x48] sm:$0xff] }
 0x153   :  { %v4477_v6 = vpack.c.bf16 %v473_v3, %v472_v1  ;;  %v3040_v1 = vld [vmem:[%s6266_s5 + $0x160] sm:$0xff]  ;;  %v3041_v3 = vld [vmem:[%s6266_s5 + $0x168] sm:$0xff] }
 0x154   :  { %v337_v17 = vsub.f32 %v335_v9, %v336_v11  ;;  %v358_v18 = vmul.f32 %v5476_v12, %v5413_v32  ;;  %v344_v19 = vmul.f32 %v5476_v12, %v5374_v57  ;;  %v352_v21 = vmul.f32 %v5476_v12, %v5395_v14  ;;  %v475_v9 = vld [vmem:[%s6266_s5 + $0x58] sm:$0xff] }
 0x155   :  { %v345_v43 = vmul.f32 %v5476_v12, %v5372_v56  ;;  %v353_v23 = vmul.f32 %v5476_v12, %v5398_v16  ;;  %v346_v24 = vmul.f32 %v5476_v12, %v5378_v61  ;;  %v354_v25 = vmul.f32 %v5476_v12, %v5401_v20 }
 0x156   :  { %v5497_v32 = vrot.slane %v337_v17, %v5457_v63  ;;  %v347_v57 = vmul.f32 %v5476_v12, %v5380_v62  ;;  %v355_v14 = vmul.f32 %v5476_v12, %v5404_v22  ;;  %v348_v56 = vmul.f32 %v5476_v12, %v5383_v2  ;;  %v478_v17 = vld [vmem:[%s6266_s5 + $0x70] sm:$0xff] }
 0x157   :  { %v356_v16 = vmul.f32 %v5476_v12, %v5407_v26  ;;  %v349_v61 = vmul.f32 %v5476_v12, %v5386_v4  ;;  %v357_v20 = vmul.f32 %v5476_v12, %v5410_v28  ;;  %v350_v27 = vmul.f32 %v5476_v12, %v5389_v8 }
 0x158   :  { %v5514_v62 = vadd.f32 %v5497_v32, %v358_v18  ;;  %v366_v22 = vadd.f32 %v5497_v32, %v344_v19  ;;  %v374_v29 = vadd.f32 %v5497_v32, %v352_v21  ;;  %v367_v2 = vadd.f32 %v5497_v32, %v345_v43  ;;  %v479_v18 = vld [vmem:[%s6266_s5 + $0x78] sm:$0xff]  ;;  %v3029_v21 = vld [vmem:[%s6266_s5 + $0x108] sm:$0xff] }
 0x159   :  { %v375_v26 = vadd.f32 %v5497_v32, %v353_v23  ;;  %v368_v30 = vadd.f32 %v5497_v32, %v346_v24  ;;  %v376_v4 = vadd.f32 %v5497_v32, %v354_v25  ;;  %v369_v28 = vadd.f32 %v5497_v32, %v347_v57  ;;  %v3030_v23 = vld [vmem:[%s6266_s5 + $0x110] sm:$0xff]  ;;  %v3031_v24 = vld [vmem:[%s6266_s5 + $0x118] sm:$0xff] }
 0x15a   :  { %v396_v31 = vmax.f32 %v5514_v62, 0.0  ;;  %v5524_v8 = vmax.f32 %v366_v22, 0.0  ;;  %v5526_v33 = vmax.f32 %v374_v29, 0.0  ;;  %v5528_v35 = vmax.f32 %v367_v2, 0.0  ;;  %v3034_v29 = vld [vmem:[%s6266_s5 + $0x130] sm:$0xff]  ;;  %v3035_v2 = vld [vmem:[%s6266_s5 + $0x138] sm:$0xff] }
 0x15b   :  { %v5530_v36 = vmax.f32 %v375_v26, 0.0  ;;  %v5532_v37 = vmax.f32 %v368_v30, 0.0  ;;  %v5534_v38 = vmax.f32 %v376_v4, 0.0  ;;  %v5536_v39 = vmax.f32 %v369_v28, 0.0  ;;  %v3036_v30 = vld [vmem:[%s6266_s5 + $0x140] sm:$0xff] }
 0x15c   :  { %454 = vst [vmem:[#allocation2 + $0x111] sm:$0xff] %v396_v31  ;;  %439 = vst [vmem:[#allocation2 + $0x11] sm:$0xff] %v5524_v8  ;;  %3662 = vmatmul.mubr.f32.vlgmr.msra.gmra.mrb[0].mxu1 %v5524_v8  ;;  %4058 = vmatmul.mubr.f32.vlgmr.msra.gmra.mrb[16].mxu0 %v5526_v33  ;;  %v377_v40 = vadd.f32 %v5497_v32, %v355_v14  ;;  %v370_v41 = vadd.f32 %v5497_v32, %v348_v56  ;;  %v3032_v56 = vld [vmem:[%s6266_s5 + $0x120] sm:$0xff] }
 0x15d   :  { %448 = vst [vmem:[#allocation2 + $0xb1] sm:$0xff] %v5526_v33  ;;  %440 = vst [vmem:[#allocation2 + $0x21] sm:$0xff] %v5528_v35  ;;  %v378_v42 = vadd.f32 %v5497_v32, %v356_v16  ;;  %4464 = vmatpush3.bf16.msra.mxu1 %v5365_v50  ;;  %4752 = vmatpush3.bf16.msra.mxu0 %v5365_v50  ;;  %v371_v45 = vadd.f32 %v5497_v32, %v349_v61  ;;  %v3033_v16 = vld [vmem:[%s6266_s5 + $0x128] sm:$0xff] }
 0x15e   :  { %449 = vst [vmem:[#allocation2 + $0xc1] sm:$0xff] %v5530_v36  ;;  %441 = vst [vmem:[#allocation2 + $0x31] sm:$0xff] %v5532_v37  ;;  %v379_v46 = vadd.f32 %v5497_v32, %v357_v20  ;;  %v372_v47 = vadd.f32 %v5497_v32, %v350_v27  ;;  %3664 = vmatprep.mubr.f32.mxu1 %v5528_v35  ;;  %4060 = vmatprep.mubr.f32.mxu0 %v5530_v36  ;;  %v5559_v48 = vmax.f32 %v377_v40, 0.0  ;;  %v3037_v40 = vld [vmem:[%s6266_s5 + $0x148] sm:$0xff] }
 0x15f   :  { %450 = vst [vmem:[#allocation2 + $0xd1] sm:$0xff] %v5534_v38  ;;  %442 = vst [vmem:[#allocation2 + $0x41] sm:$0xff] %v5536_v39  ;;  %v5561_v50 = vmax.f32 %v370_v41, 0.0  ;;  %v5563_v49 = vmax.f32 %v378_v42, 0.0  ;;  %v351_v51 = vmul.f32 %v5476_v12, %v5392_v10  ;;  %4466 = vmatprep.subr.bf16.mxu1 %v5478_v13  ;;  %4754 = vmatprep.subr.bf16.mxu0 %v5478_v13  ;;  %v5569_v52 = vmax.f32 %v371_v45, 0.0  ;;  %v470_v10 = vld [vmem:[%s6266_s5 + $0x30] sm:$0xff] }
 0x160   :  { %v5571_v53 = vmax.f32 %v379_v46, 0.0  ;;  %v5573_v54 = vmax.f32 %v372_v47, 0.0  ;;  %v359_v55 = vmul.f32 %v5476_v12, %v5416_v34  ;;  %3665 = vmatmul.mubr.f32.gmra.mrb[2].mxu1 %v5532_v37  ;;  %4061 = vmatmul.mubr.f32.gmra.mrb[18].mxu0 %v5534_v38  ;;  %451 = vst [vmem:[#allocation2 + $0xe1] sm:$0xff] %v5559_v48  ;;  %v4473_v0 = vpack.c.bf16 %v471_v58, %v470_v10  ;;  %v476_v12 = vld [vmem:[%s6266_s5 + $0x60] sm:$0xff]  ;;  %v3038_v46 = vld [vmem:[%s6266_s5 + $0x150] sm:$0xff]  ;;  %v3039_v10 = vld [vmem:[%s6266_s5 + $0x158] sm:$0xff] }
 0x161   :  { %443 = vst [vmem:[#allocation2 + $0x51] sm:$0xff] %v5561_v50  ;;  %452 = vst [vmem:[#allocation2 + $0xf1] sm:$0xff] %v5563_v49  ;;  %v5589_v34 = vadd.f32 %v5497_v32, %v351_v51  ;;  %4468 = vmatpush3.bf16.msra.mxu1 %v5478_v13  ;;  %4756 = vmatpush3.bf16.msra.mxu0 %v5478_v13  ;;  %v4481_v11 = vpack.c.bf16 %v475_v9, %v474_v7  ;;  %v477_v13 = vld [vmem:[%s6266_s5 + $0x68] sm:$0xff]  ;;  %v3042_v7 = vld [vmem:[%s6266_s5 + $0x170] sm:$0xff] }
 0x162   :  { %444 = vst [vmem:[#allocation2 + $0x61] sm:$0xff] %v5569_v52  ;;  %453 = vst [vmem:[#allocation2 + $0x101] sm:$0xff] %v5571_v53  ;;  %v5597_v59 = vadd.f32 %v5497_v32, %v359_v55  ;;  %3667 = vmatprep.mubr.f32.mxu1 %v5536_v39  ;;  %4063 = vmatprep.mubr.f32.mxu0 %v5559_v48  ;;  %v4489_v19 = vpack.c.bf16 %v479_v18, %v478_v17  ;;  %v715_v47 = vld [vmem:[#allocation2 + $0x2] sm:$0xff]  ;;  %v3043_v9 = vld [vmem:[%s6266_s5 + $0x178] sm:$0xff] }
 0x163   :  { %445 = vst [vmem:[#allocation2 + $0x71] sm:$0xff] %v5573_v54  ;;  %v389_v60 = vmax.f32 %v5589_v34, 0.0  ;;  %4470 = vmatprep.subr.bf16.mxu1 %v5480_v15  ;;  %4758 = vmatprep.subr.bf16.mxu0 %v5480_v15  ;;  %v5656_v25 = vld [vmem:[#allocation2 + $0x10] sm:$0xff]  ;;  %v4497_v57 = vpack.c.bf16 %v3031_v24, %v3030_v23  ;;  %v4501_v62 = vpack.c.bf16 %v3033_v16, %v3032_v56  ;;  %v1924_v58 = vld [vmem:[#allocation2 + $0xa2] sm:$0xff]  ;;  %v3047_v18 = vld [vmem:[%s6266_s5 + $0x198] sm:$0xff] }
 0x164   :  { %v397_v5 = vmax.f32 %v5597_v59, 0.0  ;;  %3668 = vmatmul.mubr.f32.gmra.mrb[4].mxu1 %v5561_v50  ;;  %4064 = vmatmul.mubr.f32.gmra.mrb[20].mxu0 %v5563_v49  ;;  %v5658_v32 = vld [vmem:[#allocation2 + $0xb0] sm:$0xff]  ;;  %v5662_v14 = vld [vmem:[#allocation2 + $0x20] sm:$0xff]  ;;  %v4509_v45 = vpack.c.bf16 %v3037_v40, %v3036_v30  ;;  %v3049_v24 = vld [vmem:[%s6266_s5 + $0x1a8] sm:$0xff] }
 0x165   :  { %446 = vst [vmem:[#allocation2 + $0x81] sm:$0xff] %v389_v60  ;;  %4472 = vmatpush3.bf16.msra.mxu1 %v5480_v15  ;;  %4760 = vmatpush3.bf16.msra.mxu0 %v5480_v15  ;;  %v4485_v15 = vpack.c.bf16 %v477_v13, %v476_v12  ;;  %v5671_v61 = vld [vmem:[#allocation2 + $0xc0] sm:$0xff]  ;;  %v5674_v20 = vld [vmem:[#allocation2 + $0x30] sm:$0xff]  ;;  %v3045_v13 = vld [vmem:[%s6266_s5 + $0x188] sm:$0xff] }
 0x166   :  { %455 = vst [vmem:[#allocation2 + $0x121] sm:$0xff] %v397_v5  ;;  %3670 = vmatprep.mubr.f32.mxu1 %v5569_v52  ;;  %4066 = vmatprep.mubr.f32.mxu0 %v5571_v53  ;;  %v5676_v27 = vld [vmem:[#allocation2 + $0xd0] sm:$0xff]  ;;  %v5680_v22 = vld [vmem:[#allocation2 + $0x40] sm:$0xff]  ;;  %v3051_v30 = vld [vmem:[%s6266_s5 + $0x1b8] sm:$0xff] }
 0x167   :  { %4474 = vmatprep.subr.bf16.mxu1 %v4473_v0  ;;  %4762 = vmatprep.subr.bf16.mxu0 %v4473_v0  ;;  %v5689_v26 = vld [vmem:[#allocation2 + $0xe0] sm:$0xff]  ;;  %v5715_v55 = vld [vmem:[#allocation2 + $0x110] sm:$0xff] }
 0x168   :  { %3671 = vmatmul.mubr.f32.gmra.mrb[6].mxu1 %v5573_v54  ;;  %4067 = vmatmul.mubr.f32.gmra.mrb[22].mxu0 %v396_v31  ;;  %v5695_v4 = vld [vmem:[#allocation2 + $0x50] sm:$0xff]  ;;  %v4505_v31 = vpack.c.bf16 %v3035_v2, %v3034_v29  ;;  %v3044_v12 = vld [vmem:[%s6266_s5 + $0x180] sm:$0xff] }
 0x169   :  { %4476 = vmatpush3.bf16.msra.mxu1 %v4473_v0  ;;  %4764 = vmatpush3.bf16.msra.mxu0 %v4473_v0  ;;  %v5697_v28 = vld [vmem:[#allocation2 + $0xf0] sm:$0xff]  ;;  %v5704_v41 = vld [vmem:[#allocation2 + $0x60] sm:$0xff]  ;;  %v4513_v0 = vpack.c.bf16 %v3039_v10, %v3038_v46 }
 0x16a   :  { %4478 = vmatprep.subr.bf16.mxu1 %v4477_v6  ;;  %4766 = vmatprep.subr.bf16.mxu0 %v4477_v6  ;;  %v5707_v42 = vld [vmem:[#allocation2 + $0x100] sm:$0xff]  ;;  %v5713_v51 = vld [vmem:[#allocation2 + $0x70] sm:$0xff] }
 0x16b   :  { %3705 = vmatprep.mubr.f32.mxu1 %v5141_v44  ;;  %4101 = vmatprep.mubr.f32.mxu0 %v5141_v44  ;;  %v3028_v44 = vld [vmem:[%s6266_s5 + $0x100] sm:$0xff]  ;;  %v3046_v17 = vld [vmem:[%s6266_s5 + $0x190] sm:$0xff] }
 0x16c   :  { %v4493_v43 = vpack.c.bf16 %v3029_v21, %v3028_v44  ;;  %v4529_v44 = vpack.c.bf16 %v3047_v18, %v3046_v17  ;;  %v3048_v21 = vld [vmem:[%s6266_s5 + $0x1a0] sm:$0xff]  ;;  %v5764_v56 = vld [vmem:[#allocation2 + $0x32] sm:$0xff] }
 0x16d   :  { %4480 = vmatpush3.bf16.msra.mxu1 %v4477_v6  ;;  %4768 = vmatpush3.bf16.msra.mxu0 %v4477_v6  ;;  %v4517_v6 = vpack.c.bf16 %v3041_v3, %v3040_v1  ;;  %v5754_v23 = vld [vmem:[#allocation2 + $0x22] sm:$0xff]  ;;  %v4533_v16 = vpack.c.bf16 %v3049_v24, %v3048_v21  ;;  %v5770_v29 = vld [vmem:[#allocation2 + $0xd2] sm:$0xff] }
 0x16e   :  { %4482 = vmatprep.subr.bf16.mxu1 %v4481_v11  ;;  %4770 = vmatprep.subr.bf16.mxu0 %v4481_v11  ;;  %v5772_v2 = vld [vmem:[#allocation2 + $0x42] sm:$0xff]  ;;  %v5782_v40 = vld [vmem:[#allocation2 + $0x52] sm:$0xff] }
 0x16f   :  { %v3052_v46 = vld [vmem:[%s6266_s5 + $0x1c0] sm:$0xff]  ;;  %v5800_v1 = vld [vmem:[#allocation2 + $0x72] sm:$0xff] }
 0x170   :  { %v5790_v10 = vld [vmem:[#allocation2 + $0x62] sm:$0xff]  ;;  %v3062_v24 = vld [vmem:[%s6266_s5 + $0x210] sm:$0xff] }
 0x171   :  { %4484 = vmatpush3.bf16.msra.mxu1 %v4481_v11  ;;  %4772 = vmatpush3.bf16.msra.mxu0 %v4481_v11  ;;  %v4521_v11 = vpack.c.bf16 %v3043_v9, %v3042_v7  ;;  %v3054_v7 = vld [vmem:[%s6266_s5 + $0x1d0] sm:$0xff]  ;;  %v3055_v9 = vld [vmem:[%s6266_s5 + $0x1d8] sm:$0xff]  ;;  %v3060_v18 = vld [vmem:[%s6266_s5 + $0x200] sm:$0xff] }
 0x172   :  { %4486 = vmatprep.subr.bf16.mxu1 %v4485_v15  ;;  %4774 = vmatprep.subr.bf16.mxu0 %v4485_v15  ;;  %v3090_v59 = vld [vmem:[%s6266_s5 + $0x2f0] sm:$0xff] }
 0x175   :  { %4488 = vmatpush3.bf16.msra.mxu1 %v4485_v15  ;;  %4776 = vmatpush3.bf16.msra.mxu0 %v4485_v15  ;;  %v4525_v15 = vpack.c.bf16 %v3045_v13, %v3044_v12  ;;  %v3056_v12 = vld [vmem:[%s6266_s5 + $0x1e0] sm:$0xff]  ;;  %v3057_v13 = vld [vmem:[%s6266_s5 + $0x1e8] sm:$0xff] }
 0x176   :  { %4490 = vmatprep.subr.bf16.mxu1 %v4489_v19  ;;  %4778 = vmatprep.subr.bf16.mxu0 %v4489_v19 }
 0x179   :  { %4492 = vmatpush3.bf16.msra.mxu1 %v4489_v19  ;;  %4780 = vmatpush3.bf16.msra.mxu0 %v4489_v19  ;;  %v5746_v19 = vld [vmem:[#allocation2 + $0x12] sm:$0xff] }
 0x17a   :  { %4494 = vmatprep.subr.bf16.mxu1 %v4493_v43  ;;  %4782 = vmatprep.subr.bf16.mxu0 %v4493_v43 }
 0x17c   :  { %3706 = vmatmul.mubr.f32.vlgmr.msra.gmra.mrb[0].mxu1 %v5656_v25  ;;  %4102 = vmatmul.mubr.f32.vlgmr.msra.gmra.mrb[16].mxu0 %v5658_v32 }
 0x17d   :  { %3708 = vmatprep.mubr.f32.mxu1 %v5662_v14  ;;  %4496 = vmatpush3.bf16.msra.mxu1 %v4493_v43 }
 0x17e   :  { %4104 = vmatprep.mubr.f32.mxu0 %v5671_v61  ;;  %4784 = vmatpush3.bf16.msra.mxu0 %v4493_v43  ;;  %v5752_v43 = vld [vmem:[#allocation2 + $0xb2] sm:$0xff] }
 0x17f   :  { %4498 = vmatprep.subr.bf16.mxu1 %v4497_v57  ;;  %4786 = vmatprep.subr.bf16.mxu0 %v4497_v57 }
 0x180   :  { %3709 = vmatmul.mubr.f32.gmra.mrb[2].mxu1 %v5674_v20  ;;  %4105 = vmatmul.mubr.f32.gmra.mrb[18].mxu0 %v5676_v27 }
 0x181   :  { %3711 = vmatprep.mubr.f32.mxu1 %v5680_v22  ;;  %4500 = vmatpush3.bf16.msra.mxu1 %v4497_v57 }
 0x182   :  { %4107 = vmatprep.mubr.f32.mxu0 %v5689_v26  ;;  %4788 = vmatpush3.bf16.msra.mxu0 %v4497_v57  ;;  %v5761_v57 = vld [vmem:[#allocation2 + $0xc2] sm:$0xff] }
 0x183   :  { %4502 = vmatprep.subr.bf16.mxu1 %v4501_v62  ;;  %4790 = vmatprep.subr.bf16.mxu0 %v4501_v62 }
 0x184   :  { %3712 = vmatmul.mubr.f32.gmra.mrb[4].mxu1 %v5695_v4  ;;  %4108 = vmatmul.mubr.f32.gmra.mrb[20].mxu0 %v5697_v28 }
 0x185   :  { %3714 = vmatprep.mubr.f32.mxu1 %v5704_v41  ;;  %4504 = vmatpush3.bf16.msra.mxu1 %v4501_v62 }
 0x186   :  { %4110 = vmatprep.mubr.f32.mxu0 %v5707_v42  ;;  %4792 = vmatpush3.bf16.msra.mxu0 %v4501_v62  ;;  %v3050_v62 = vld [vmem:[%s6266_s5 + $0x1b0] sm:$0xff] }
 0x187   :  { %4506 = vmatprep.subr.bf16.mxu1 %v4505_v31  ;;  %4794 = vmatprep.subr.bf16.mxu0 %v4505_v31 }
 0x188   :  { %3715 = vmatmul.mubr.f32.gmra.mrb[6].mxu1 %v5713_v51  ;;  %4111 = vmatmul.mubr.f32.gmra.mrb[22].mxu0 %v5715_v55 }
 0x189   :  { %4508 = vmatpush3.bf16.msra.mxu1 %v4505_v31  ;;  %3749 = vmatprep.mubr.f32.mxu1 %v715_v47  ;;  %v5788_v47 = vld [vmem:[#allocation2 + $0xf2] sm:$0xff] }
 0x18a   :  { %4796 = vmatpush3.bf16.msra.mxu0 %v4505_v31  ;;  %4510 = vmatprep.subr.bf16.mxu1 %v4509_v45  ;;  %v5779_v31 = vld [vmem:[#allocation2 + $0xe2] sm:$0xff] }
 0x18b   :  { %4798 = vmatprep.subr.bf16.mxu0 %v4509_v45  ;;  %4145 = vmatprep.mubr.f32.mxu0 %v1924_v58  ;;  %v3053_v58 = vld [vmem:[%s6266_s5 + $0x1c8] sm:$0xff] }
 0x18c   :  { %v4541_v3 = vpack.c.bf16 %v3053_v58, %v3052_v46  ;;  %v3066_v58 = vld [vmem:[%s6266_s5 + $0x230] sm:$0xff] }
 0x18d   :  { %4512 = vmatpush3.bf16.msra.mxu1 %v4509_v45 }
 0x18e   :  { %4800 = vmatpush3.bf16.msra.mxu0 %v4509_v45  ;;  %4514 = vmatprep.subr.bf16.mxu1 %v4513_v0  ;;  %v4537_v45 = vpack.c.bf16 %v3051_v30, %v3050_v62  ;;  %v3064_v30 = vld [vmem:[%s6266_s5 + $0x220] sm:$0xff] }
 0x18f   :  { %4802 = vmatprep.subr.bf16.mxu0 %v4513_v0 }
 0x191   :  { %4516 = vmatpush3.bf16.msra.mxu1 %v4513_v0 }
 0x192   :  { %4804 = vmatpush3.bf16.msra.mxu0 %v4513_v0  ;;  %4518 = vmatprep.subr.bf16.mxu1 %v4517_v6  ;;  %v5797_v0 = vld [vmem:[#allocation2 + $0x102] sm:$0xff] }
 0x193   :  { %4806 = vmatprep.subr.bf16.mxu0 %v4517_v6 }
 0x195   :  { %4520 = vmatpush3.bf16.msra.mxu1 %v4517_v6 }
 0x196   :  { %4808 = vmatpush3.bf16.msra.mxu0 %v4517_v6  ;;  %4522 = vmatprep.subr.bf16.mxu1 %v4521_v11  ;;  %v5803_v6 = vld [vmem:[#allocation2 + $0x112] sm:$0xff] }
 0x197   :  { %4810 = vmatprep.subr.bf16.mxu0 %v4521_v11 }
 0x199   :  { %4524 = vmatpush3.bf16.msra.mxu1 %v4521_v11 }
 0x19a   :  { %4812 = vmatpush3.bf16.msra.mxu0 %v4521_v11  ;;  %4526 = vmatprep.subr.bf16.mxu1 %v4525_v15  ;;  %v4545_v11 = vpack.c.bf16 %v3055_v9, %v3054_v7  ;;  %v3068_v9 = vld [vmem:[%s6266_s5 + $0x240] sm:$0xff] }
 0x19b   :  { %4814 = vmatprep.subr.bf16.mxu0 %v4525_v15 }
 0x19c   :  { %3750 = vmatmul.mubr.f32.vlgmr.msra.gmra.mrb[0].mxu1 %v5746_v19 }
 0x19d   :  { %4146 = vmatmul.mubr.f32.vlgmr.msra.gmra.mrb[16].mxu0 %v5752_v43  ;;  %3752 = vmatprep.mubr.f32.mxu1 %v5754_v23 }
 0x19e   :  { %4528 = vmatpush3.bf16.msra.mxu1 %v4525_v15  ;;  %4148 = vmatprep.mubr.f32.mxu0 %v5761_v57 }
 0x19f   :  { %4816 = vmatpush3.bf16.msra.mxu0 %v4525_v15  ;;  %4530 = vmatprep.subr.bf16.mxu1 %v4529_v44  ;;  %v4549_v15 = vpack.c.bf16 %v3057_v13, %v3056_v12  ;;  %v5868_v12 = vld [vmem:[#allocation2 + $0x80] sm:$0xff] }
 0x1a0   :  { %3753 = vmatmul.mubr.f32.gmra.mrb[2].mxu1 %v5764_v56  ;;  %4818 = vmatprep.subr.bf16.mxu0 %v4529_v44 }
 0x1a1   :  { %4149 = vmatmul.mubr.f32.gmra.mrb[18].mxu0 %v5770_v29  ;;  %3755 = vmatprep.mubr.f32.mxu1 %v5772_v2 }
 0x1a2   :  { %4532 = vmatpush3.bf16.msra.mxu1 %v4529_v44  ;;  %4151 = vmatprep.mubr.f32.mxu0 %v5779_v31 }
 0x1a3   :  { %4820 = vmatpush3.bf16.msra.mxu0 %v4529_v44  ;;  %4534 = vmatprep.subr.bf16.mxu1 %v4533_v16  ;;  %v3061_v44 = vld [vmem:[%s6266_s5 + $0x208] sm:$0xff] }
 0x1a4   :  { %3756 = vmatmul.mubr.f32.gmra.mrb[4].mxu1 %v5782_v40  ;;  %4822 = vmatprep.subr.bf16.mxu0 %v4533_v16  ;;  %v4557_v21 = vpack.c.bf16 %v3061_v44, %v3060_v18  ;;  %v3072_v18 = vld [vmem:[%s6266_s5 + $0x260] sm:$0xff]  ;;  %v3073_v44 = vld [vmem:[%s6266_s5 + $0x268] sm:$0xff] }
 0x1a5   :  { %4152 = vmatmul.mubr.f32.gmra.mrb[20].mxu0 %v5788_v47  ;;  %3758 = vmatprep.mubr.f32.mxu1 %v5790_v10 }
 0x1a6   :  { %4536 = vmatpush3.bf16.msra.mxu1 %v4533_v16  ;;  %4154 = vmatprep.mubr.f32.mxu0 %v5797_v0 }
 0x1a7   :  { %4824 = vmatpush3.bf16.msra.mxu0 %v4533_v16  ;;  %4538 = vmatprep.subr.bf16.mxu1 %v4537_v45  ;;  %v3063_v16 = vld [vmem:[%s6266_s5 + $0x218] sm:$0xff] }
 0x1a8   :  { %3759 = vmatmul.mubr.f32.gmra.mrb[6].mxu1 %v5800_v1  ;;  %4826 = vmatprep.subr.bf16.mxu0 %v4537_v45  ;;  %v4561_v62 = vpack.c.bf16 %v3063_v16, %v3062_v24  ;;  %v3076_v16 = vld [vmem:[%s6266_s5 + $0x280] sm:$0xff] }
 0x1a9   :  { %4155 = vmatmul.mubr.f32.gmra.mrb[22].mxu0 %v5803_v6  ;;  %3793 = vmatprep.mubr.f32.mxu1 %v5656_v25  ;;  %v3058_v25 = vld [vmem:[%s6266_s5 + $0x1f0] sm:$0xff] }
 0x1aa   :  { %4540 = vmatpush3.bf16.msra.mxu1 %v4537_v45  ;;  %4189 = vmatprep.mubr.f32.mxu0 %v5658_v32  ;;  %v3059_v32 = vld [vmem:[%s6266_s5 + $0x1f8] sm:$0xff] }
 0x1ab   :  { %4828 = vmatpush3.bf16.msra.mxu0 %v4537_v45  ;;  %4542 = vmatprep.subr.bf16.mxu1 %v4541_v3  ;;  %v4553_v17 = vpack.c.bf16 %v3059_v32, %v3058_v25  ;;  %v3065_v45 = vld [vmem:[%s6266_s5 + $0x228] sm:$0xff]  ;;  %v3070_v25 = vld [vmem:[%s6266_s5 + $0x250] sm:$0xff]  ;;  %v3071_v32 = vld [vmem:[%s6266_s5 + $0x258] sm:$0xff] }
 0x1ac   :  { %4830 = vmatprep.subr.bf16.mxu0 %v4541_v3  ;;  %v4565_v46 = vpack.c.bf16 %v3065_v45, %v3064_v30  ;;  %v3078_v45 = vld [vmem:[%s6266_s5 + $0x290] sm:$0xff] }
 0x1ae   :  { %4544 = vmatpush3.bf16.msra.mxu1 %v4541_v3 }
 0x1af   :  { %4832 = vmatpush3.bf16.msra.mxu0 %v4541_v3  ;;  %4546 = vmatprep.subr.bf16.mxu1 %v4545_v11  ;;  %v3067_v3 = vld [vmem:[%s6266_s5 + $0x238] sm:$0xff] }
 0x1b0   :  { %4834 = vmatprep.subr.bf16.mxu0 %v4545_v11  ;;  %v4569_v7 = vpack.c.bf16 %v3067_v3, %v3066_v58  ;;  %v3080_v3 = vld [vmem:[%s6266_s5 + $0x2a0] sm:$0xff] }
 0x1b2   :  { %4548 = vmatpush3.bf16.msra.mxu1 %v4545_v11 }
 0x1b3   :  { %4836 = vmatpush3.bf16.msra.mxu0 %v4545_v11  ;;  %4550 = vmatprep.subr.bf16.mxu1 %v4549_v15  ;;  %v3069_v11 = vld [vmem:[%s6266_s5 + $0x248] sm:$0xff] }
 0x1b4   :  { %4838 = vmatprep.subr.bf16.mxu0 %v4549_v15  ;;  %v4573_v13 = vpack.c.bf16 %v3069_v11, %v3068_v9  ;;  %v3083_v11 = vld [vmem:[%s6266_s5 + $0x2b8] sm:$0xff] }
 0x1b6   :  { %4552 = vmatpush3.bf16.msra.mxu1 %v4549_v15 }
 0x1b7   :  { %4840 = vmatpush3.bf16.msra.mxu0 %v4549_v15  ;;  %4554 = vmatprep.subr.bf16.mxu1 %v4553_v17  ;;  %v5871_v15 = vld [vmem:[#allocation2 + $0x120] sm:$0xff] }
 0x1b8   :  { %4842 = vmatprep.subr.bf16.mxu0 %v4553_v17 }
 0x1ba   :  { %4556 = vmatpush3.bf16.msra.mxu1 %v4553_v17 }
 0x1bb   :  { %4844 = vmatpush3.bf16.msra.mxu0 %v4553_v17  ;;  %4558 = vmatprep.subr.bf16.mxu1 %v4557_v21  ;;  %v4577_v17 = vpack.c.bf16 %v3071_v32, %v3070_v25  ;;  %v3094_v25 = vld [vmem:[%s6266_s5 + $0x310] sm:$0xff]  ;;  %v3095_v32 = vld [vmem:[%s6266_s5 + $0x318] sm:$0xff] }
 0x1bc   :  { %4846 = vmatprep.subr.bf16.mxu0 %v4557_v21 }
 0x1bd   :  { %3794 = vmatmul.mubr.f32.vlgmr.msra.gmra.mrb[0].mxu1 %v5662_v14 }
 0x1be   :  { %4190 = vmatmul.mubr.f32.vlgmr.msra.gmra.mrb[16].mxu0 %v5671_v61  ;;  %3796 = vmatprep.mubr.f32.mxu1 %v5674_v20 }
 0x1bf   :  { %4560 = vmatpush3.bf16.msra.mxu1 %v4557_v21  ;;  %4192 = vmatprep.mubr.f32.mxu0 %v5676_v27 }
 0x1c0   :  { %4848 = vmatpush3.bf16.msra.mxu0 %v4557_v21  ;;  %4562 = vmatprep.subr.bf16.mxu1 %v4561_v62  ;;  %v4581_v21 = vpack.c.bf16 %v3073_v44, %v3072_v18  ;;  %v3096_v18 = vld [vmem:[%s6266_s5 + $0x320] sm:$0xff]  ;;  %v3097_v44 = vld [vmem:[%s6266_s5 + $0x328] sm:$0xff] }
 0x1c1   :  { %3797 = vmatmul.mubr.f32.gmra.mrb[2].mxu1 %v5680_v22  ;;  %4850 = vmatprep.subr.bf16.mxu0 %v4561_v62 }
 0x1c2   :  { %4193 = vmatmul.mubr.f32.gmra.mrb[18].mxu0 %v5689_v26  ;;  %3799 = vmatprep.mubr.f32.mxu1 %v5695_v4 }
 0x1c3   :  { %4564 = vmatpush3.bf16.msra.mxu1 %v4561_v62  ;;  %4195 = vmatprep.mubr.f32.mxu0 %v5697_v28 }
 0x1c4   :  { %4852 = vmatpush3.bf16.msra.mxu0 %v4561_v62  ;;  %4566 = vmatprep.subr.bf16.mxu1 %v4565_v46  ;;  %v3077_v62 = vld [vmem:[%s6266_s5 + $0x288] sm:$0xff] }
 0x1c5   :  { %3800 = vmatmul.mubr.f32.gmra.mrb[4].mxu1 %v5704_v41  ;;  %4854 = vmatprep.subr.bf16.mxu0 %v4565_v46  ;;  %v4589_v30 = vpack.c.bf16 %v3077_v62, %v3076_v16  ;;  %v3102_v16 = vld [vmem:[%s6266_s5 + $0x350] sm:$0xff]  ;;  %v3103_v62 = vld [vmem:[%s6266_s5 + $0x358] sm:$0xff] }
 0x1c6   :  { %4196 = vmatmul.mubr.f32.gmra.mrb[20].mxu0 %v5707_v42  ;;  %3802 = vmatprep.mubr.f32.mxu1 %v5713_v51 }
 0x1c7   :  { %4568 = vmatpush3.bf16.msra.mxu1 %v4565_v46  ;;  %4198 = vmatprep.mubr.f32.mxu0 %v5715_v55 }
 0x1c8   :  { %4856 = vmatpush3.bf16.msra.mxu0 %v4565_v46  ;;  %4570 = vmatprep.subr.bf16.mxu1 %v4569_v7  ;;  %v3079_v46 = vld [vmem:[%s6266_s5 + $0x298] sm:$0xff] }
 0x1c9   :  { %3803 = vmatmul.mubr.f32.gmra.mrb[6].mxu1 %v5868_v12  ;;  %4858 = vmatprep.subr.bf16.mxu0 %v4569_v7  ;;  %v4593_v58 = vpack.c.bf16 %v3079_v46, %v3078_v45  ;;  %v3104_v45 = vld [vmem:[%s6266_s5 + $0x360] sm:$0xff]  ;;  %v3105_v46 = vld [vmem:[%s6266_s5 + $0x368] sm:$0xff] }
 0x1ca   :  { %4199 = vmatmul.mubr.f32.gmra.mrb[22].mxu0 %v5871_v15  ;;  %3837 = vmatprep.mubr.f32.mxu1 %v5524_v8  ;;  %v3074_v8 = vld [vmem:[%s6266_s5 + $0x270] sm:$0xff] }
 0x1cb   :  { %4572 = vmatpush3.bf16.msra.mxu1 %v4569_v7  ;;  %4233 = vmatprep.mubr.f32.mxu0 %v5526_v33  ;;  %v3075_v33 = vld [vmem:[%s6266_s5 + $0x278] sm:$0xff] }
 0x1cc   :  { %4860 = vmatpush3.bf16.msra.mxu0 %v4569_v7  ;;  %4574 = vmatprep.subr.bf16.mxu1 %v4573_v13  ;;  %v4585_v24 = vpack.c.bf16 %v3075_v33, %v3074_v8  ;;  %v3081_v7 = vld [vmem:[%s6266_s5 + $0x2a8] sm:$0xff]  ;;  %v3098_v8 = vld [vmem:[%s6266_s5 + $0x330] sm:$0xff]  ;;  %v3099_v33 = vld [vmem:[%s6266_s5 + $0x338] sm:$0xff] }
 0x1cd   :  { %4862 = vmatprep.subr.bf16.mxu0 %v4573_v13  ;;  %v4597_v9 = vpack.c.bf16 %v3081_v7, %v3080_v3  ;;  %v3108_v7 = vld [vmem:[%s6266_s5 + $0x380] sm:$0xff] }
 0x1cf   :  { %4576 = vmatpush3.bf16.msra.mxu1 %v4573_v13 }
 0x1d0   :  { %4864 = vmatpush3.bf16.msra.mxu0 %v4573_v13  ;;  %4578 = vmatprep.subr.bf16.mxu1 %v4577_v17 }
 0x1d1   :  { %4866 = vmatprep.subr.bf16.mxu0 %v4577_v17 }
 0x1d3   :  { %4580 = vmatpush3.bf16.msra.mxu1 %v4577_v17 }
 0x1d4   :  { %4868 = vmatpush3.bf16.msra.mxu0 %v4577_v17  ;;  %4582 = vmatprep.subr.bf16.mxu1 %v4581_v21  ;;  %v4625_v17 = vpack.c.bf16 %v3095_v32, %v3094_v25  ;;  %v1407_v25 = vld [vmem:[#allocation2 + $0x31] sm:$0xff] }
 0x1d5   :  { %4870 = vmatprep.subr.bf16.mxu0 %v4581_v21  ;;  %v2531_v32 = vld [vmem:[#allocation2 + $0xd1] sm:$0xff] }
 0x1d7   :  { %4584 = vmatpush3.bf16.msra.mxu1 %v4581_v21 }
 0x1d8   :  { %4872 = vmatpush3.bf16.msra.mxu0 %v4581_v21  ;;  %4586 = vmatprep.subr.bf16.mxu1 %v4585_v24  ;;  %v4629_v21 = vpack.c.bf16 %v3097_v44, %v3096_v18  ;;  %v1408_v18 = vld [vmem:[#allocation2 + $0x41] sm:$0xff] }
 0x1d9   :  { %4874 = vmatprep.subr.bf16.mxu0 %v4585_v24  ;;  %v3128_v44 = vld [vmem:[%s6266_s5 + $0x420] sm:$0xff] }
 0x1db   :  { %4588 = vmatpush3.bf16.msra.mxu1 %v4585_v24 }
 0x1dc   :  { %4876 = vmatpush3.bf16.msra.mxu0 %v4585_v24  ;;  %4590 = vmatprep.subr.bf16.mxu1 %v4589_v30  ;;  %v6007_v24 = vld [vmem:[#allocation2 + $0x122] sm:$0xff] }
 0x1dd   :  { %4878 = vmatprep.subr.bf16.mxu0 %v4589_v30 }
 0x1de   :  { %3838 = vmatmul.mubr.f32.vlgmr.msra.gmra.mrb[0].mxu1 %v5528_v35  ;;  %v3082_v35 = vld [vmem:[%s6266_s5 + $0x2b0] sm:$0xff] }
 0x1df   :  { %4234 = vmatmul.mubr.f32.vlgmr.msra.gmra.mrb[16].mxu0 %v5530_v36  ;;  %3840 = vmatprep.mubr.f32.mxu1 %v5532_v37  ;;  %v4601_v36 = vpack.c.bf16 %v3083_v11, %v3082_v35  ;;  %v3084_v37 = vld [vmem:[%s6266_s5 + $0x2c0] sm:$0xff]  ;;  %v3110_v11 = vld [vmem:[%s6266_s5 + $0x390] sm:$0xff] }
 0x1e0   :  { %4592 = vmatpush3.bf16.msra.mxu1 %v4589_v30  ;;  %4236 = vmatprep.mubr.f32.mxu0 %v5534_v38  ;;  %v3085_v38 = vld [vmem:[%s6266_s5 + $0x2c8] sm:$0xff] }
 0x1e1   :  { %4880 = vmatpush3.bf16.msra.mxu0 %v4589_v30  ;;  %4594 = vmatprep.subr.bf16.mxu1 %v4593_v58  ;;  %v4641_v30 = vpack.c.bf16 %v3103_v62, %v3102_v16  ;;  %v3131_v16 = vld [vmem:[%s6266_s5 + $0x438] sm:$0xff]  ;;  %v2534_v62 = vld [vmem:[#allocation2 + $0x101] sm:$0xff] }
 0x1e2   :  { %3841 = vmatmul.mubr.f32.gmra.mrb[2].mxu1 %v5536_v39  ;;  %4882 = vmatprep.subr.bf16.mxu0 %v4593_v58  ;;  %v5935_v39 = vld [vmem:[#allocation2 + $0x111] sm:$0xff] }
 0x1e3   :  { %4237 = vmatmul.mubr.f32.gmra.mrb[18].mxu0 %v5559_v48  ;;  %3843 = vmatprep.mubr.f32.mxu1 %v5561_v50  ;;  %v4605_v48 = vpack.c.bf16 %v3085_v38, %v3084_v37  ;;  %v3086_v50 = vld [vmem:[%s6266_s5 + $0x2d0] sm:$0xff]  ;;  %v3112_v38 = vld [vmem:[%s6266_s5 + $0x3a0] sm:$0xff] }
 0x1e4   :  { %4596 = vmatpush3.bf16.msra.mxu1 %v4593_v58  ;;  %4239 = vmatprep.mubr.f32.mxu0 %v5563_v49  ;;  %v3087_v49 = vld [vmem:[%s6266_s5 + $0x2d8] sm:$0xff] }
 0x1e5   :  { %4884 = vmatpush3.bf16.msra.mxu0 %v4593_v58  ;;  %4598 = vmatprep.subr.bf16.mxu1 %v4597_v9  ;;  %v4645_v58 = vpack.c.bf16 %v3105_v46, %v3104_v45  ;;  %v3132_v46 = vld [vmem:[%s6266_s5 + $0x440] sm:$0xff] }
 0x1e6   :  { %3844 = vmatmul.mubr.f32.gmra.mrb[4].mxu1 %v5569_v52  ;;  %4886 = vmatprep.subr.bf16.mxu0 %v4597_v9  ;;  %v4609_v52 = vpack.c.bf16 %v3087_v49, %v3086_v50  ;;  %v3115_v49 = vld [vmem:[%s6266_s5 + $0x3b8] sm:$0xff] }
 0x1e7   :  { %4240 = vmatmul.mubr.f32.gmra.mrb[20].mxu0 %v5571_v53  ;;  %3846 = vmatprep.mubr.f32.mxu1 %v5573_v54  ;;  %v3088_v53 = vld [vmem:[%s6266_s5 + $0x2e0] sm:$0xff]  ;;  %v3089_v54 = vld [vmem:[%s6266_s5 + $0x2e8] sm:$0xff] }
 0x1e8   :  { %4600 = vmatpush3.bf16.msra.mxu1 %v4597_v9  ;;  %4242 = vmatprep.mubr.f32.mxu0 %v5935_v39  ;;  %v4613_v34 = vpack.c.bf16 %v3089_v54, %v3088_v53  ;;  %v3122_v54 = vld [vmem:[%s6266_s5 + $0x3f0] sm:$0xff] }
 0x1e9   :  { %4888 = vmatpush3.bf16.msra.mxu0 %v4597_v9  ;;  %4602 = vmatprep.subr.bf16.mxu1 %v4601_v36  ;;  %v3109_v9 = vld [vmem:[%s6266_s5 + $0x388] sm:$0xff] }
 0x1ea   :  { %3847 = vmatmul.mubr.f32.gmra.mrb[6].mxu1 %v389_v60  ;;  %4890 = vmatprep.subr.bf16.mxu0 %v4601_v36  ;;  %v3091_v60 = vld [vmem:[%s6266_s5 + $0x2f8] sm:$0xff]  ;;  %v4653_v35 = vpack.c.bf16 %v3109_v9, %v3108_v7 }
 0x1eb   :  { %4243 = vmatmul.mubr.f32.gmra.mrb[22].mxu0 %v397_v5  ;;  %3881 = vmatprep.mubr.f32.mxu1 %v5746_v19  ;;  %v4617_v5 = vpack.c.bf16 %v3091_v60, %v3090_v59  ;;  %v3092_v19 = vld [vmem:[%s6266_s5 + $0x300] sm:$0xff]  ;;  %v2537_v7 = vld [vmem:[#allocation2 + $0x131] sm:$0xff] }
 0x1ec   :  { %4604 = vmatpush3.bf16.msra.mxu1 %v4601_v36  ;;  %4277 = vmatprep.mubr.f32.mxu0 %v5752_v43  ;;  %v3093_v43 = vld [vmem:[%s6266_s5 + $0x308] sm:$0xff]  ;;  %v3124_v60 = vld [vmem:[%s6266_s5 + $0x400] sm:$0xff] }
 0x1ed   :  { %4892 = vmatpush3.bf16.msra.mxu0 %v4601_v36  ;;  %4606 = vmatprep.subr.bf16.mxu1 %v4605_v48  ;;  %v4621_v13 = vpack.c.bf16 %v3093_v43, %v3092_v19  ;;  %v3111_v36 = vld [vmem:[%s6266_s5 + $0x398] sm:$0xff]  ;;  %v3126_v43 = vld [vmem:[%s6266_s5 + $0x410] sm:$0xff] }
 0x1ee   :  { %4894 = vmatprep.subr.bf16.mxu0 %v4605_v48  ;;  %v4657_v37 = vpack.c.bf16 %v3111_v36, %v3110_v11  ;;  %v3136_v36 = vld [vmem:[%s6266_s5 + $0x460] sm:$0xff] }
 0x1f0   :  { %4608 = vmatpush3.bf16.msra.mxu1 %v4605_v48 }
 0x1f1   :  { %4896 = vmatpush3.bf16.msra.mxu0 %v4605_v48  ;;  %4610 = vmatprep.subr.bf16.mxu1 %v4609_v52  ;;  %v3113_v48 = vld [vmem:[%s6266_s5 + $0x3a8] sm:$0xff] }
 0x1f2   :  { %4898 = vmatprep.subr.bf16.mxu0 %v4609_v52  ;;  %v4661_v50 = vpack.c.bf16 %v3113_v48, %v3112_v38 }
 0x1f4   :  { %4612 = vmatpush3.bf16.msra.mxu1 %v4609_v52 }
 0x1f5   :  { %4900 = vmatpush3.bf16.msra.mxu0 %v4609_v52  ;;  %4614 = vmatprep.subr.bf16.mxu1 %v4613_v34  ;;  %v3121_v52 = vld [vmem:[%s6266_s5 + $0x3e8] sm:$0xff] }
 0x1f6   :  { %4902 = vmatprep.subr.bf16.mxu0 %v4613_v34 }
 0x1f8   :  { %4616 = vmatpush3.bf16.msra.mxu1 %v4613_v34 }
 0x1f9   :  { %4904 = vmatpush3.bf16.msra.mxu0 %v4613_v34  ;;  %4618 = vmatprep.subr.bf16.mxu1 %v4617_v5  ;;  %v3123_v34 = vld [vmem:[%s6266_s5 + $0x3f8] sm:$0xff] }
 0x1fa   :  { %4906 = vmatprep.subr.bf16.mxu0 %v4617_v5  ;;  %v4681_v59 = vpack.c.bf16 %v3123_v34, %v3122_v54 }
 0x1fc   :  { %4620 = vmatpush3.bf16.msra.mxu1 %v4617_v5 }
 0x1fd   :  { %4908 = vmatpush3.bf16.msra.mxu0 %v4617_v5  ;;  %4622 = vmatprep.subr.bf16.mxu1 %v4621_v13  ;;  %v3125_v5 = vld [vmem:[%s6266_s5 + $0x408] sm:$0xff] }
 0x1fe   :  { %4910 = vmatprep.subr.bf16.mxu0 %v4621_v13  ;;  %v4685_v19 = vpack.c.bf16 %v3125_v5, %v3124_v60 }
 0x1ff   :  { %3882 = vmatmul.mubr.f32.vlgmr.msra.gmra.mrb[0].mxu1 %v5754_v23 }
 0x200   :  { %4278 = vmatmul.mubr.f32.vlgmr.msra.gmra.mrb[16].mxu0 %v5761_v57  ;;  %3884 = vmatprep.mubr.f32.mxu1 %v5764_v56  ;;  %v4633_v56 = vpack.c.bf16 %v3099_v33, %v3098_v8  ;;  %v2532_v8 = vld [vmem:[#allocation2 + $0xe1] sm:$0xff]  ;;  %v1409_v33 = vld [vmem:[#allocation2 + $0x51] sm:$0xff] }
 0x201   :  { %4624 = vmatpush3.bf16.msra.mxu1 %v4621_v13  ;;  %4280 = vmatprep.mubr.f32.mxu0 %v5770_v29  ;;  %v3100_v29 = vld [vmem:[%s6266_s5 + $0x340] sm:$0xff] }
 0x202   :  { %4912 = vmatpush3.bf16.msra.mxu0 %v4621_v13  ;;  %4626 = vmatprep.subr.bf16.mxu1 %v4625_v17  ;;  %v3127_v13 = vld [vmem:[%s6266_s5 + $0x418] sm:$0xff] }
 0x203   :  { %3885 = vmatmul.mubr.f32.gmra.mrb[2].mxu1 %v5772_v2  ;;  %4914 = vmatprep.subr.bf16.mxu0 %v4625_v17  ;;  %v3101_v2 = vld [vmem:[%s6266_s5 + $0x348] sm:$0xff] }
 0x204   :  { %4281 = vmatmul.mubr.f32.gmra.mrb[18].mxu0 %v5779_v31  ;;  %3887 = vmatprep.mubr.f32.mxu1 %v5782_v40  ;;  %v6004_v31 = vld [vmem:[#allocation2 + $0x82] sm:$0xff]  ;;  %v4637_v40 = vpack.c.bf16 %v3101_v2, %v3100_v29 }
 0x205   :  { %4628 = vmatpush3.bf16.msra.mxu1 %v4625_v17  ;;  %4283 = vmatprep.mubr.f32.mxu0 %v5788_v47  ;;  %v1410_v2 = vld [vmem:[#allocation2 + $0x61] sm:$0xff] }
 0x206   :  { %4916 = vmatpush3.bf16.msra.mxu0 %v4625_v17  ;;  %4630 = vmatprep.subr.bf16.mxu1 %v4629_v21  ;;  %v4689_v17 = vpack.c.bf16 %v3127_v13, %v3126_v43 }
 0x207   :  { %3888 = vmatmul.mubr.f32.gmra.mrb[4].mxu1 %v5790_v10  ;;  %4918 = vmatprep.subr.bf16.mxu0 %v4629_v21 }
 0x208   :  { %4284 = vmatmul.mubr.f32.gmra.mrb[20].mxu0 %v5797_v0  ;;  %3890 = vmatprep.mubr.f32.mxu1 %v5800_v1 }
 0x209   :  { %4632 = vmatpush3.bf16.msra.mxu1 %v4629_v21  ;;  %4286 = vmatprep.mubr.f32.mxu0 %v5803_v6 }
 0x20a   :  { %4920 = vmatpush3.bf16.msra.mxu0 %v4629_v21  ;;  %4634 = vmatprep.subr.bf16.mxu1 %v4633_v56  ;;  %v3129_v21 = vld [vmem:[%s6266_s5 + $0x428] sm:$0xff] }
 0x20b   :  { %3891 = vmatmul.mubr.f32.gmra.mrb[6].mxu1 %v6004_v31  ;;  %4922 = vmatprep.subr.bf16.mxu0 %v4633_v56  ;;  %v4693_v29 = vpack.c.bf16 %v3129_v21, %v3128_v44 }
 0x20c   :  { %4287 = vmatmul.mubr.f32.gmra.mrb[22].mxu0 %v6007_v24  ;;  %3925 = vmatprep.mubr.f32.mxu1 %v5662_v14  ;;  %v3106_v14 = vld [vmem:[%s6266_s5 + $0x370] sm:$0xff] }
 0x20d   :  { %4636 = vmatpush3.bf16.msra.mxu1 %v4633_v56  ;;  %4321 = vmatprep.mubr.f32.mxu0 %v5671_v61  ;;  %v3107_v61 = vld [vmem:[%s6266_s5 + $0x378] sm:$0xff] }
 0x20e   :  { %4924 = vmatpush3.bf16.msra.mxu0 %v4633_v56  ;;  %4638 = vmatprep.subr.bf16.mxu1 %v4637_v40  ;;  %v4649_v3 = vpack.c.bf16 %v3107_v61, %v3106_v14  ;;  %v2533_v56 = vld [vmem:[#allocation2 + $0xf1] sm:$0xff]  ;;  %v5139_v14 = vld [vmem:[#allocation2 + $0x81] sm:$0xff] }
 0x20f   :  { %4926 = vmatprep.subr.bf16.mxu0 %v4637_v40  ;;  %v1413_v61 = vld [vmem:[#allocation2 + $0x91] sm:$0xff] }
 0x211   :  { %4640 = vmatpush3.bf16.msra.mxu1 %v4637_v40 }
 0x212   :  { %4928 = vmatpush3.bf16.msra.mxu0 %v4637_v40  ;;  %4642 = vmatprep.subr.bf16.mxu1 %v4641_v30  ;;  %v3130_v40 = vld [vmem:[%s6266_s5 + $0x430] sm:$0xff] }
 0x213   :  { %4930 = vmatprep.subr.bf16.mxu0 %v4641_v30  ;;  %v4697_v45 = vpack.c.bf16 %v3131_v16, %v3130_v40 }
 0x215   :  { %4644 = vmatpush3.bf16.msra.mxu1 %v4641_v30 }
 0x216   :  { %4932 = vmatpush3.bf16.msra.mxu0 %v4641_v30  ;;  %4646 = vmatprep.subr.bf16.mxu1 %v4645_v58  ;;  %v1411_v30 = vld [vmem:[#allocation2 + $0x71] sm:$0xff] }
 0x217   :  { %4934 = vmatprep.subr.bf16.mxu0 %v4645_v58 }
 0x219   :  { %4648 = vmatpush3.bf16.msra.mxu1 %v4645_v58 }
 0x21a   :  { %4936 = vmatpush3.bf16.msra.mxu0 %v4645_v58  ;;  %4650 = vmatprep.subr.bf16.mxu1 %v4649_v3  ;;  %v3133_v58 = vld [vmem:[%s6266_s5 + $0x448] sm:$0xff] }
 0x21b   :  { %4938 = vmatprep.subr.bf16.mxu0 %v4649_v3  ;;  %v4701_v9 = vpack.c.bf16 %v3133_v58, %v3132_v46 }
 0x21d   :  { %4652 = vmatpush3.bf16.msra.mxu1 %v4649_v3 }
 0x21e   :  { %4940 = vmatpush3.bf16.msra.mxu0 %v4649_v3  ;;  %4654 = vmatprep.subr.bf16.mxu1 %v4653_v35  ;;  %v5140_v3 = vld [vmem:[#allocation2 + $0x121] sm:$0xff] }
 0x21f   :  { %4942 = vmatprep.subr.bf16.mxu0 %v4653_v35 }
 0x220   :  { %3926 = vmatmul.mubr.f32.vlgmr.msra.gmra.mrb[0].mxu1 %v5674_v20  ;;  %v3114_v20 = vld [vmem:[%s6266_s5 + $0x3b0] sm:$0xff] }
 0x221   :  { %4322 = vmatmul.mubr.f32.vlgmr.msra.gmra.mrb[16].mxu0 %v5676_v27  ;;  %3928 = vmatprep.mubr.f32.mxu1 %v5680_v22  ;;  %v4665_v27 = vpack.c.bf16 %v3115_v49, %v3114_v20  ;;  %v3116_v22 = vld [vmem:[%s6266_s5 + $0x3c0] sm:$0xff]  ;;  %v2652_v20 = vld [vmem:[#allocation2 + $0xd2] sm:$0xff] }
 0x222   :  { %4656 = vmatpush3.bf16.msra.mxu1 %v4653_v35  ;;  %4324 = vmatprep.mubr.f32.mxu0 %v5689_v26  ;;  %v3117_v26 = vld [vmem:[%s6266_s5 + $0x3c8] sm:$0xff] }
 0x223   :  { %4944 = vmatpush3.bf16.msra.mxu0 %v4653_v35  ;;  %4658 = vmatprep.subr.bf16.mxu1 %v4657_v37  ;;  %v3134_v35 = vld [vmem:[%s6266_s5 + $0x450] sm:$0xff]  ;;  %v1546_v49 = vld [vmem:[#allocation2 + $0x42] sm:$0xff] }
 0x224   :  { %3929 = vmatmul.mubr.f32.gmra.mrb[2].mxu1 %v5695_v4  ;;  %4946 = vmatprep.subr.bf16.mxu0 %v4657_v37  ;;  %v4669_v4 = vpack.c.bf16 %v3117_v26, %v3116_v22  ;;  %v1547_v22 = vld [vmem:[#allocation2 + $0x52] sm:$0xff] }
 0x225   :  { %4325 = vmatmul.mubr.f32.gmra.mrb[18].mxu0 %v5697_v28  ;;  %3931 = vmatprep.mubr.f32.mxu1 %v5704_v41  ;;  %v5138_v28 = vld [vmem:[#allocation2] sm:$0xff]  ;;  %v1551_v26 = vld [vmem:[#allocation2 + $0x92] sm:$0xff] }
 0x226   :  { %4660 = vmatpush3.bf16.msra.mxu1 %v4657_v37  ;;  %4327 = vmatprep.mubr.f32.mxu0 %v5707_v42  ;;  %v1406_v41 = vld [vmem:[#allocation2 + $0x21] sm:$0xff]  ;;  %v3118_v42 = vld [vmem:[%s6266_s5 + $0x3d0] sm:$0xff] }
 0x227   :  { %4948 = vmatpush3.bf16.msra.mxu0 %v4657_v37  ;;  %4662 = vmatprep.subr.bf16.mxu1 %v4661_v50  ;;  %v3137_v37 = vld [vmem:[%s6266_s5 + $0x468] sm:$0xff] }
 0x228   :  { %3932 = vmatmul.mubr.f32.gmra.mrb[4].mxu1 %v5713_v51  ;;  %4950 = vmatprep.subr.bf16.mxu0 %v4661_v50  ;;  %v3119_v51 = vld [vmem:[%s6266_s5 + $0x3d8] sm:$0xff]  ;;  %v4709_v38 = vpack.c.bf16 %v3137_v37, %v3136_v36 }
 0x229   :  { %4328 = vmatmul.mubr.f32.gmra.mrb[20].mxu0 %v5715_v55  ;;  %3934 = vmatprep.mubr.f32.mxu1 %v5868_v12  ;;  %v2530_v55 = vld [vmem:[#allocation2 + $0xc1] sm:$0xff]  ;;  %v4673_v12 = vpack.c.bf16 %v3119_v51, %v3118_v42 }
 0x22a   :  { %4664 = vmatpush3.bf16.msra.mxu1 %v4661_v50  ;;  %4330 = vmatprep.mubr.f32.mxu0 %v5871_v15  ;;  %v3120_v15 = vld [vmem:[%s6266_s5 + $0x3e0] sm:$0xff] }
 0x22b   :  { %4952 = vmatpush3.bf16.msra.mxu0 %v4661_v50  ;;  %4666 = vmatprep.subr.bf16.mxu1 %v4665_v27  ;;  %v4677_v53 = vpack.c.bf16 %v3121_v52, %v3120_v15  ;;  %v1545_v50 = vld [vmem:[#allocation2 + $0x32] sm:$0xff] }
 0x22c   :  { %3935 = vmatmul.mubr.f32.gmra.mrb[6].mxu1 %v5138_v28  ;;  %4954 = vmatprep.subr.bf16.mxu0 %v4665_v27 }
 0x22d   :  { %4331 = vmatmul.mubr.f32.gmra.mrb[22].mxu0 %v5138_v28  ;;  %3969 = vmatprep.mubr.f32.mxu1 %v1406_v41 }
 0x22e   :  { %4668 = vmatpush3.bf16.msra.mxu1 %v4665_v27  ;;  %4365 = vmatprep.mubr.f32.mxu0 %v2530_v55 }
 0x22f   :  { %4956 = vmatpush3.bf16.msra.mxu0 %v4665_v27  ;;  %4670 = vmatprep.subr.bf16.mxu1 %v4669_v4  ;;  %v2653_v27 = vld [vmem:[#allocation2 + $0xe2] sm:$0xff] }
 0x230   :  { %4958 = vmatprep.subr.bf16.mxu0 %v4669_v4 }
 0x232   :  { %4672 = vmatpush3.bf16.msra.mxu1 %v4669_v4 }
 0x233   :  { %4960 = vmatpush3.bf16.msra.mxu0 %v4669_v4  ;;  %4674 = vmatprep.subr.bf16.mxu1 %v4673_v12  ;;  %v2658_v4 = vld [vmem:[#allocation2 + $0x132] sm:$0xff] }
 0x234   :  { %4962 = vmatprep.subr.bf16.mxu0 %v4673_v12 }
 0x236   :  { %4676 = vmatpush3.bf16.msra.mxu1 %v4673_v12 }
 0x237   :  { %4964 = vmatpush3.bf16.msra.mxu0 %v4673_v12  ;;  %4678 = vmatprep.subr.bf16.mxu1 %v4677_v53 }
 0x238   :  { %4966 = vmatprep.subr.bf16.mxu0 %v4677_v53 }
 0x23a   :  { %4680 = vmatpush3.bf16.msra.mxu1 %v4677_v53 }
 0x23b   :  { %4968 = vmatpush3.bf16.msra.mxu0 %v4677_v53  ;;  %4682 = vmatprep.subr.bf16.mxu1 %v4681_v59 }
 0x23c   :  { %4970 = vmatprep.subr.bf16.mxu0 %v4681_v59 }
 0x23e   :  { %4684 = vmatpush3.bf16.msra.mxu1 %v4681_v59 }
 0x23f   :  { %4972 = vmatpush3.bf16.msra.mxu0 %v4681_v59  ;;  %4686 = vmatprep.subr.bf16.mxu1 %v4685_v19 }
 0x240   :  { %4974 = vmatprep.subr.bf16.mxu0 %v4685_v19 }
 0x241   :  { %3970 = vmatmul.mubr.f32.vlgmr.msra.gmra.mrb[0].mxu1 %v1407_v25 }
 0x242   :  { %4366 = vmatmul.mubr.f32.vlgmr.msra.gmra.mrb[16].mxu0 %v2531_v32  ;;  %3972 = vmatprep.mubr.f32.mxu1 %v1408_v18 }
 0x243   :  { %4688 = vmatpush3.bf16.msra.mxu1 %v4685_v19  ;;  %4368 = vmatprep.mubr.f32.mxu0 %v2532_v8 }
 0x244   :  { %4976 = vmatpush3.bf16.msra.mxu0 %v4685_v19  ;;  %4690 = vmatprep.subr.bf16.mxu1 %v4689_v17 }
 0x245   :  { %3973 = vmatmul.mubr.f32.gmra.mrb[2].mxu1 %v1409_v33  ;;  %4978 = vmatprep.subr.bf16.mxu0 %v4689_v17 }
 0x246   :  { %4369 = vmatmul.mubr.f32.gmra.mrb[18].mxu0 %v2533_v56  ;;  %3975 = vmatprep.mubr.f32.mxu1 %v1410_v2 }
 0x247   :  { %4692 = vmatpush3.bf16.msra.mxu1 %v4689_v17  ;;  %4371 = vmatprep.mubr.f32.mxu0 %v2534_v62 }
 0x248   :  { %4980 = vmatpush3.bf16.msra.mxu0 %v4689_v17  ;;  %4694 = vmatprep.subr.bf16.mxu1 %v4693_v29 }
 0x249   :  { %3976 = vmatmul.mubr.f32.gmra.mrb[4].mxu1 %v1411_v30  ;;  %4982 = vmatprep.subr.bf16.mxu0 %v4693_v29 }
 0x24a   :  { %4372 = vmatmul.mubr.f32.gmra.mrb[20].mxu0 %v5935_v39  ;;  %3978 = vmatprep.mubr.f32.mxu1 %v5139_v14  ;;  %v3135_v39 = vld [vmem:[%s6266_s5 + $0x458] sm:$0xff] }
 0x24b   :  { %4696 = vmatpush3.bf16.msra.mxu1 %v4693_v29  ;;  %4374 = vmatprep.mubr.f32.mxu0 %v5140_v3  ;;  %v4705_v11 = vpack.c.bf16 %v3135_v39, %v3134_v35 }
 0x24c   :  { %4984 = vmatpush3.bf16.msra.mxu0 %v4693_v29  ;;  %4698 = vmatprep.subr.bf16.mxu1 %v4697_v45 }
 0x24d   :  { %3979 = vmatmul.mubr.f32.gmra.mrb[6].mxu1 %v1413_v61  ;;  %4986 = vmatprep.subr.bf16.mxu0 %v4697_v45 }
 0x24e   :  { %4375 = vmatmul.mubr.f32.gmra.mrb[22].mxu0 %v2537_v7  ;;  %4013 = vmatprep.mubr.f32.mxu1 %v5754_v23  ;;  %v3138_v23 = vld [vmem:[%s6266_s5 + $0x470] sm:$0xff] }
 0x24f   :  { %4700 = vmatpush3.bf16.msra.mxu1 %v4697_v45  ;;  %4409 = vmatprep.mubr.f32.mxu0 %v5761_v57  ;;  %v3139_v57 = vld [vmem:[%s6266_s5 + $0x478] sm:$0xff] }
 0x250   :  { %4988 = vmatpush3.bf16.msra.mxu0 %v4697_v45  ;;  %4702 = vmatprep.subr.bf16.mxu1 %v4701_v9  ;;  %v4713_v48 = vpack.c.bf16 %v3139_v57, %v3138_v23 }
 0x251   :  { %4990 = vmatprep.subr.bf16.mxu0 %v4701_v9 }
 0x253   :  { %4704 = vmatpush3.bf16.msra.mxu1 %v4701_v9 }
 0x254   :  { %4992 = vmatpush3.bf16.msra.mxu0 %v4701_v9  ;;  %4706 = vmatprep.subr.bf16.mxu1 %v4705_v11 }
 0x255   :  { %4994 = vmatprep.subr.bf16.mxu0 %v4705_v11 }
 0x257   :  { %4708 = vmatpush3.bf16.msra.mxu1 %v4705_v11 }
 0x258   :  { %4996 = vmatpush3.bf16.msra.mxu0 %v4705_v11  ;;  %4710 = vmatprep.subr.bf16.mxu1 %v4709_v38 }
 0x259   :  { %4998 = vmatprep.subr.bf16.mxu0 %v4709_v38 }
 0x25b   :  { %4712 = vmatpush3.bf16.msra.mxu1 %v4709_v38 }
 0x25c   :  { %5000 = vmatpush3.bf16.msra.mxu0 %v4709_v38  ;;  %4714 = vmatprep.subr.bf16.mxu1 %v4713_v48 }
 0x25d   :  { %5002 = vmatprep.subr.bf16.mxu0 %v4713_v48 }
 0x25f   :  { %4716 = vmatpush3.bf16.msra.mxu1 %v4713_v48 }
 0x260   :  { %5004 = vmatpush3.bf16.msra.mxu0 %v4713_v48 }
 0x262   :  { %4014 = vmatmul.mubr.f32.vlgmr.msra.gmra.mrb[0].mxu1 %v1545_v50 }
 0x263   :  { %4410 = vmatmul.mubr.f32.vlgmr.msra.gmra.mrb[16].mxu0 %v2652_v20  ;;  %4016 = vmatprep.mubr.f32.mxu1 %v1546_v49 }
 0x264   :  { %4412 = vmatprep.mubr.f32.mxu0 %v2653_v27 }
 0x266   :  { %4017 = vmatmul.mubr.f32.gmra.mrb[2].mxu1 %v1547_v22 }
 0x267   :  { %4413 = vmatmul.mubr.f32.gmra.mrb[18].mxu0 %v5788_v47  ;;  %4019 = vmatprep.mubr.f32.mxu1 %v5790_v10  ;;  %v3140_v47 = vld [vmem:[%s6270_s6] ss:$0 sm:$0xff] }
 0x268   :  { %4415 = vmatprep.mubr.f32.mxu0 %v5797_v0 }
 0x26a   :  { %4020 = vmatmul.mubr.f32.gmra.mrb[4].mxu1 %v5800_v1 }
 0x26b   :  { %4416 = vmatmul.mubr.f32.gmra.mrb[20].mxu0 %v5803_v6  ;;  %4022 = vmatprep.mubr.f32.mxu1 %v6004_v31 }
 0x26c   :  { %4418 = vmatprep.mubr.f32.mxu0 %v6007_v24 }
 0x26e   :  { %4023 = vmatmul.mubr.f32.gmra.mrb[6].mxu1 %v1551_v26 }
 0x26f   :  { %4419 = vmatmul.mubr.f32.gmra.mrb[22].mxu0 %v2658_v4 }
 0x335   :  { %v4015_v28 = vpop.f32.mrb[0].mxu1 }
 0x336   :  { %v4411_v10 = vpop.f32.mrb[16].mxu0  ;;  %v1635_v41 = vpop.f32.mrb[1].mxu1  ;;  %v6151_v0 = vadd.f32 %v4015_v28, %v3140_v47 }
 0x337   :  { %v6153_v1 = vadd.f32 %v3140_v47, %v1635_v41  ;;  %v2725_v6 = vpop.f32.mrb[17].mxu0  ;;  %v6177_v29 = vadd.f32 %v4411_v10, %v3140_v47 }
 0x338   :  { %v6174_v33 = vadd.f32 %v3140_v47, %v2725_v6 }
 0x339   :  { %v4018_v42 = vpop.f32.mrb[2].mxu1  ;;  %v2780_v24 = vadd.f32 %v6151_v0, %v6153_v1 }
 0x33a   :  { %v4414_v31 = vpop.f32.mrb[18].mxu0  ;;  %v1645_v51 = vpop.f32.mrb[3].mxu1  ;;  %v6159_v15 = vadd.f32 %v4018_v42, %v3140_v47 }
 0x33b   :  { %v6157_v55 = vadd.f32 %v3140_v47, %v1645_v51  ;;  %v2735_v12 = vpop.f32.mrb[19].mxu0  ;;  %v6183_v62 = vadd.f32 %v4414_v31, %v3140_v47 }
 0x33c   :  { %v6180_v40 = vadd.f32 %v3140_v47, %v2735_v12 }
 0x33d   :  { %v2781_v52 = vadd.f32 %v2780_v24, %v6157_v55  ;;  %v4021_v53 = vpop.f32.mrb[4].mxu1 }
 0x33e   :  { %v4417_v54 = vpop.f32.mrb[20].mxu0  ;;  %v1655_v34 = vpop.f32.mrb[5].mxu1  ;;  %v6165_v19 = vadd.f32 %v4021_v53, %v3140_v47 }
 0x33f   :  { %v6162_v59 = vadd.f32 %v3140_v47, %v1655_v34  ;;  %v2782_v60 = vadd.f32 %v2781_v52, %v6159_v15  ;;  %v2745_v5 = vpop.f32.mrb[21].mxu0  ;;  %v6189_v58 = vadd.f32 %v4417_v54, %v3140_v47 }
 0x340   :  { %v6186_v45 = vadd.f32 %v3140_v47, %v2745_v5 }
 0x341   :  { %v2783_v43 = vadd.f32 %v2782_v60, %v6162_v59  ;;  %v4024_v13 = vpop.f32.mrb[6].mxu1 }
 0x342   :  { %v4420_v25 = vpop.f32.mrb[22].mxu0  ;;  %v1665_v32 = vpop.f32.mrb[7].mxu1  ;;  %v6171_v21 = vadd.f32 %v4024_v13, %v3140_v47 }
 0x343   :  { %v6168_v17 = vadd.f32 %v3140_v47, %v1665_v32  ;;  %v2784_v18 = vadd.f32 %v2783_v43, %v6165_v19  ;;  %v2755_v44 = vpop.f32.mrb[23].mxu0  ;;  %v6195_v7 = vadd.f32 %v4420_v25, %v3140_v47 }
 0x344   :  { %v6192_v61 = vadd.f32 %v3140_v47, %v2755_v44 }
 0x345   :  { %v2785_v8 = vadd.f32 %v2784_v18, %v6168_v17 }
 0x347   :  { %v2786_v56 = vadd.f32 %v2785_v8, %v6171_v21 }
 0x349   :  { %v2787_v2 = vadd.f32 %v2786_v56, %v6174_v33 }
 0x34b   :  { %v2788_v16 = vadd.f32 %v2787_v2, %v6177_v29 }
 0x34d   :  { %v2789_v30 = vadd.f32 %v2788_v16, %v6180_v40 }
 0x34f   :  { %v2790_v46 = vadd.f32 %v2789_v30, %v6183_v62 }
 0x351   :  { %v2791_v14 = vadd.f32 %v2790_v46, %v6186_v45 }
 0x353   :  { %v2792_v3 = vadd.f32 %v2791_v14, %v6189_v58 }
 0x355   :  { %v2793_v9 = vadd.f32 %v2792_v3, %v6192_v61 }
 0x357   :  { %v2794_v35 = vadd.f32 %v2793_v9, %v6195_v7 }
 0x359   :  { %v2795_v39 = vrot.slane %v2794_v35, 4 }
 0x35b   :  { %v2796_v11 = vadd.f32 %v2795_v39, %v2794_v35 }
 0x35d   :  { %v2797_v36 = vrot.slane %v2796_v11, 2 }
 0x35f   :  { %v2798_v37 = vadd.f32 %v2797_v36, %v2796_v11 }
 0x361   :  { %v2799_v38 = vrot.slane %v2798_v37, 1 }
 0x363   :  { %v2800_v23 = vadd.f32 %v2799_v38, %v2798_v37 }
 0x365   :  { %v6199_v57 = vmul.f32 0.0078125, %v2800_v23 }
 0x367   :  { %v2802_v48 = vsub.f32 %v6153_v1, %v6199_v57  ;;  %v2803_v50 = vsub.f32 %v6151_v0, %v6199_v57  ;;  %v2804_v20 = vsub.f32 %v6157_v55, %v6199_v57  ;;  %v2805_v22 = vsub.f32 %v6159_v15, %v6199_v57 }
 0x368   :  { %v2806_v26 = vsub.f32 %v6162_v59, %v6199_v57  ;;  %v2807_v28 = vsub.f32 %v6165_v19, %v6199_v57  ;;  %v2808_v6 = vsub.f32 %v6168_v17, %v6199_v57  ;;  %v2809_v51 = vsub.f32 %v6171_v21, %v6199_v57 }
 0x369   :  { %v2818_v49 = vmul.f32 %v2802_v48, %v2802_v48  ;;  %v2819_v27 = vmul.f32 %v2803_v50, %v2803_v50  ;;  %v2820_v4 = vmul.f32 %v2804_v20, %v2804_v20  ;;  %v2821_v10 = vmul.f32 %v2805_v22, %v2805_v22 }
 0x36a   :  { %v2822_v42 = vmul.f32 %v2806_v26, %v2806_v26  ;;  %v2823_v24 = vmul.f32 %v2807_v28, %v2807_v28  ;;  %v2810_v52 = vsub.f32 %v6174_v33, %v6199_v57  ;;  %v2824_v53 = vmul.f32 %v2808_v6, %v2808_v6  ;;  %v2856_v28 = vld [vmem:[%s6271_s7] sm:$0x1] }
 0x36b   :  { %v2834_v47 = vadd.f32 %v2819_v27, %v2818_v49  ;;  %v2811_v34 = vsub.f32 %v6177_v29, %v6199_v57  ;;  %v2825_v60 = vmul.f32 %v2809_v51, %v2809_v51  ;;  %v2812_v43 = vsub.f32 %v6180_v40, %v6199_v57  ;;  %v2860_v6 = vld [vmem:[%s6272_s8] sm:$0x1] }
 0x36c   :  { %v2826_v13 = vmul.f32 %v2810_v52, %v2810_v52  ;;  %v2813_v32 = vsub.f32 %v6183_v62, %v6199_v57  ;;  %v2814_v8 = vsub.f32 %v6186_v45, %v6199_v57  ;;  %v2815_v16 = vsub.f32 %v6189_v58, %v6199_v57 }
 0x36d   :  { %v2835_v41 = vadd.f32 %v2834_v47, %v2820_v4  ;;  %v2827_v18 = vmul.f32 %v2811_v34, %v2811_v34  ;;  %v2828_v56 = vmul.f32 %v2812_v43, %v2812_v43  ;;  %v2816_v14 = vsub.f32 %v6192_v61, %v6199_v57 }
 0x36e   :  { %v2829_v30 = vmul.f32 %v2813_v32, %v2813_v32  ;;  %v2830_v3 = vmul.f32 %v2814_v8, %v2814_v8  ;;  %v2817_v35 = vsub.f32 %v6195_v7, %v6199_v57  ;;  %v2831_v39 = vmul.f32 %v2815_v16, %v2815_v16 }
 0x36f   :  { %v2836_v31 = vadd.f32 %v2835_v41, %v2821_v10  ;;  %v2832_v36 = vmul.f32 %v2816_v14, %v2816_v14 }
 0x370   :  { %v2833_v38 = vmul.f32 %v2817_v35, %v2817_v35 }
 0x371   :  { %v2837_v12 = vadd.f32 %v2836_v31, %v2822_v42 }
 0x373   :  { %v2838_v54 = vadd.f32 %v2837_v12, %v2823_v24 }
 0x375   :  { %v2839_v5 = vadd.f32 %v2838_v54, %v2824_v53 }
 0x377   :  { %v2840_v25 = vadd.f32 %v2839_v5, %v2825_v60 }
 0x379   :  { %v2841_v44 = vadd.f32 %v2840_v25, %v2826_v13 }
 0x37b   :  { %v2842_v2 = vadd.f32 %v2841_v44, %v2827_v18 }
 0x37d   :  { %v2843_v46 = vadd.f32 %v2842_v2, %v2828_v56 }
 0x37f   :  { %v2844_v9 = vadd.f32 %v2843_v46, %v2829_v30 }
 0x381   :  { %v2845_v11 = vadd.f32 %v2844_v9, %v2830_v3 }
 0x383   :  { %v2846_v37 = vadd.f32 %v2845_v11, %v2831_v39 }
 0x385   :  { %v2847_v23 = vadd.f32 %v2846_v37, %v2832_v36 }
 0x387   :  { %v2848_v48 = vadd.f32 %v2847_v23, %v2833_v38 }
 0x389   :  { %v2849_v50 = vrot.slane %v2848_v48, 4 }
 0x38b   :  { %v2850_v20 = vadd.f32 %v2849_v50, %v2848_v48 }
 0x38d   :  { %v2851_v49 = vrot.slane %v2850_v20, 2 }
 0x38f   :  { %v2852_v27 = vadd.f32 %v2851_v49, %v2850_v20 }
 0x391   :  { %v2853_v22 = vrot.slane %v2852_v27, 1 }
 0x393   :  { %v2854_v26 = vadd.f32 %v2853_v22, %v2852_v27 }
 0x395   :  { %v2855_v4 = vmul.f32 0.0078125, %v2854_v26 }
 0x397   :  { %v2857_v47 = vadd.f32 1e-05, %v2855_v4 }
 0x399   :  { %5136 = vrsqrt.f32 %v2857_v47 }
 0x3a3   :  { %v5137_v10 = vpop.eup %5136 }
 0x3a4   :  { %v2859_v41 = vmul.f32 %v5137_v10, %v2856_v28 }
 0x3a6   :  { %v2861_v42 = vmul.f32 %v2859_v41, %v6199_v57  ;;  %v2867_v31 = vrot.slane %v2859_v41, %v5457_v63 }
 0x3a8   :  { %v2862_v51 = vsub.f32 %v2860_v6, %v2861_v42  ;;  %v2877_v12 = vmul.f32 %v2867_v31, %v6174_v33  ;;  %v2869_v52 = vmul.f32 %v2867_v31, %v6153_v1  ;;  %v2878_v34 = vmul.f32 %v2867_v31, %v6177_v29 }
 0x3a9   :  { %v2870_v60 = vmul.f32 %v2867_v31, %v6151_v0  ;;  %v2879_v57 = vmul.f32 %v2867_v31, %v6180_v40  ;;  %v2880_v29 = vmul.f32 %v2867_v31, %v6183_v62  ;;  %v2872_v0 = vmul.f32 %v2867_v31, %v6159_v15 }
 0x3aa   :  { %v2889_v24 = vrot.slane %v2862_v51, %v5457_v63  ;;  %v2871_v63 = vmul.f32 %v2867_v31, %v6157_v55  ;;  %v2881_v40 = vmul.f32 %v2867_v31, %v6186_v45  ;;  %v2873_v55 = vmul.f32 %v2867_v31, %v6162_v59 }
 0x3ab   :  { %v2882_v62 = vmul.f32 %v2867_v31, %v6189_v58  ;;  %v2874_v15 = vmul.f32 %v2867_v31, %v6165_v19  ;;  %v2883_v45 = vmul.f32 %v2867_v31, %v6192_v61  ;;  %v2875_v59 = vmul.f32 %v2867_v31, %v6168_v17 }
 0x3ac   :  { %v2899_v53 = vadd.f32 %v2889_v24, %v2877_v12  ;;  %v2891_v54 = vadd.f32 %v2889_v24, %v2869_v52  ;;  %v2900_v13 = vadd.f32 %v2889_v24, %v2878_v34  ;;  %v2892_v25 = vadd.f32 %v2889_v24, %v2870_v60 }
 0x3ad   :  { %v2901_v18 = vadd.f32 %v2889_v24, %v2879_v57  ;;  %v2893_v1 = vadd.f32 %v2889_v24, %v2871_v63  ;;  %v2902_v56 = vadd.f32 %v2889_v24, %v2880_v29  ;;  %v2894_v2 = vadd.f32 %v2889_v24, %v2872_v0 }
 0x3ae   :  { %v2915_v5 = vmax.f32 %v2899_v53, 0.0  ;;  %v2907_v43 = vmax.f32 %v2891_v54, 0.0  ;;  %v2916_v32 = vmax.f32 %v2900_v13, 0.0  ;;  %v2908_v33 = vmax.f32 %v2892_v25, 0.0 }
 0x3af   :  { %v2917_v44 = vmax.f32 %v2901_v18, 0.0  ;;  %v2909_v8 = vmax.f32 %v2893_v1, 0.0  ;;  %v2918_v16 = vmax.f32 %v2902_v56, 0.0  ;;  %v2910_v30 = vmax.f32 %v2894_v2, 0.0 }
 0x3b0   :  { %2957 = vxpose.xlu1.b32.start [1/8] (short) (narrow) %v2915_v5, 8  ;;  %2923 = vxpose.xlu0.b32.start [1/8] (short) (narrow) %v2907_v43, 8  ;;  %v2903_v46 = vadd.f32 %v2889_v24, %v2881_v40  ;;  %v2895_v14 = vadd.f32 %v2889_v24, %v2873_v55  ;;  %v2904_v35 = vadd.f32 %v2889_v24, %v2882_v62 }
 0x3b1   :  { %v2896_v39 = vadd.f32 %v2889_v24, %v2874_v15  ;;  %v2905_v37 = vadd.f32 %v2889_v24, %v2883_v45  ;;  %v2897_v38 = vadd.f32 %v2889_v24, %v2875_v59  ;;  %v2884_v58 = vmul.f32 %v2867_v31, %v6195_v7 }
 0x3b2   :  { %v2919_v3 = vmax.f32 %v2903_v46, 0.0  ;;  %v2911_v9 = vmax.f32 %v2895_v14, 0.0  ;;  %v2920_v11 = vmax.f32 %v2904_v35, 0.0  ;;  %v2876_v19 = vmul.f32 %v2867_v31, %v6171_v21 }
 0x3b3   :  { %v2912_v36 = vmax.f32 %v2896_v39, 0.0  ;;  %v2921_v23 = vmax.f32 %v2905_v37, 0.0  ;;  %v2913_v48 = vmax.f32 %v2897_v38, 0.0  ;;  %v2906_v50 = vadd.f32 %v2889_v24, %v2884_v58 }
 0x3b4   :  { %2958 = vxpose.xlu1.b32.cont [2/8] (short) (narrow) %v2916_v32, 8  ;;  %2924 = vxpose.xlu0.b32.cont [2/8] (short) (narrow) %v2908_v33, 8  ;;  %v2898_v20 = vadd.f32 %v2889_v24, %v2876_v19 }
 0x3b5   :  { %v2922_v49 = vmax.f32 %v2906_v50, 0.0 }
 0x3b6   :  { %v2914_v61 = vmax.f32 %v2898_v20, 0.0 }
 0x3b8   :  { %2959 = vxpose.xlu1.b32.cont [3/8] (short) (narrow) %v2917_v44, 8  ;;  %2925 = vxpose.xlu0.b32.cont [3/8] (short) (narrow) %v2909_v8, 8 }
 0x3bc   :  { %2960 = vxpose.xlu1.b32.cont [4/8] (short) (narrow) %v2918_v16, 8  ;;  %2926 = vxpose.xlu0.b32.cont [4/8] (short) (narrow) %v2910_v30, 8 }
 0x3c0   :  { %2961 = vxpose.xlu1.b32.cont [5/8] (short) (narrow) %v2919_v3, 8  ;;  %2927 = vxpose.xlu0.b32.cont [5/8] (short) (narrow) %v2911_v9, 8 }
 0x3c4   :  { %2962 = vxpose.xlu1.b32.cont [6/8] (short) (narrow) %v2920_v11, 8  ;;  %2928 = vxpose.xlu0.b32.cont [6/8] (short) (narrow) %v2912_v36, 8 }
 0x3c8   :  { %2963 = vxpose.xlu1.b32.cont [7/8] (short) (narrow) %v2921_v23, 8  ;;  %2929 = vxpose.xlu0.b32.cont [7/8] (short) (narrow) %v2913_v48, 8 }
 0x3cc   :  { %2964 = vxpose.xlu1.b32.end [8/8] (short) (narrow) %v2922_v49, 8  ;;  %2930 = vxpose.xlu0.b32.end [8/8] (short) (narrow) %v2914_v61, 8 }
 0x430   :  { %v2973_v17 = vpop.trf.xlu1  ;;  %v2939_v27 = vpop.trf.xlu0 }
 0x431   :  { %3141 = vst.msk [vmem:[%s6273_s9 + $0x8] sm:$0xff] %vm2955_vm1, %v2973_v17  ;;  %2956 = vst.msk [vmem:[%s6273_s9] sm:$0xff] %vm2955_vm1, %v2939_v27 }

</bundles_post_ra>
